<compile_context>
chip_gen: v5e
topology: v5e:2x2
jax: 0.10.0
libtpu: 0.0.40
codegen_flags: <defaults>
</compile_context>

<pallas_src>
import functools

import jax
import jax.numpy as jnp
from jax.experimental import pallas as pl
from jax.experimental.pallas import tpu as pltpu


def _round_up(x, m):
    return ((x + m - 1) // m) * m


# ---------------------------------------------------------------------------
# Shared in-kernel math, all in (D, TB) layout (latent dim on sublanes, batch
# tile on lanes).
# ---------------------------------------------------------------------------
def _transfer_dtb(e, t, rt):
    """TransD projection + F.normalize(p=2) along the feature axis (axis 0)."""
    proj = e + jnp.sum(e * t, axis=0, keepdims=True) * rt
    # x / max(||x||, 1e-12) == x * rsqrt(max(||x||^2, 1e-24))  (rsqrt -> EUP)
    ss = jnp.sum(proj * proj, axis=0, keepdims=True)
    return proj * jax.lax.rsqrt(jnp.maximum(ss, 1e-24))


def _l1_score_dtb(h, r, t):
    """torch.norm(h + r - t, 1, dim=feature) -> (1, TB) lane-major."""
    return jnp.sum(jnp.abs(h + r - t), axis=0, keepdims=True)


def _emit_outputs(p_score, n_score, take_ref, out_ref, margin):
    mask = take_ref[...]                                        # (1, TB) {0,1}
    out_ref[0, 0:1, :] = -n_score
    # MarginRankingLoss(margin, reduction='sum') with y = -1 over `take` rows:
    #   sum_i relu((p_i - n_i) + margin); wrapper sums the per-row partials.
    out_ref[0, 1:2, :] = mask * jnp.maximum(p_score - n_score + margin, 0.0)


# ---------------------------------------------------------------------------
# Path 1 (default): tables VMEM-resident, in-kernel one-hot @ table gather.
# ---------------------------------------------------------------------------
def _transd_fused_kernel(idx_ref, take_ref, ent_e_ref, ent_t_ref,
                         rel_e_ref, rel_t_ref, out_ref, *, margin):
    """idx_ref:  (6, TB) int32, rows = [p_h, p_t, n_h, n_t, p_r, n_r]
       take_ref: (1, TB) f32 mask (0 on padded rows)
       tables:   (Dp, rows_p) transposed/padded, VMEM-resident (constant map)
       out_ref:  (1, 2, TB) f32: row0 = -_n_score, row1 = masked hinge partials
    """
    f32 = jnp.float32
    tb = idx_ref.shape[1]
    idx = idx_ref[...]                                          # (6, TB)
    ent_e = ent_e_ref[...]
    ent_t = ent_t_ref[...]
    rel_e = rel_e_ref[...]
    rel_t = rel_t_ref[...]
    gdt = ent_e.dtype

    def one_hot(row, nrows):
        ids = idx[row:row + 1, :]                               # (1, TB)
        r = jax.lax.broadcasted_iota(jnp.int32, (nrows, tb), 0)
        return jnp.where(r == ids, 1.0, 0.0).astype(gdt)        # (nrows, TB)

    def gather(tbl, oh):                                        # MXU gather
        return jnp.dot(tbl, oh, preferred_element_type=f32)     # (Dp, TB)

    # Positive triple first, negative second -> bounded live temporaries.
    oh_pr = one_hot(4, rel_e.shape[1])
    p_r_t = gather(rel_t, oh_pr)
    oh = one_hot(0, ent_e.shape[1])
    p_h = _transfer_dtb(gather(ent_e, oh), gather(ent_t, oh), p_r_t)
    oh = one_hot(1, ent_e.shape[1])
    p_t = _transfer_dtb(gather(ent_e, oh), gather(ent_t, oh), p_r_t)
    p_score = _l1_score_dtb(p_h, gather(rel_e, oh_pr), p_t)

    oh_nr = one_hot(5, rel_e.shape[1])
    n_r_t = gather(rel_t, oh_nr)
    oh = one_hot(2, ent_e.shape[1])
    n_h = _transfer_dtb(gather(ent_e, oh), gather(ent_t, oh), n_r_t)
    oh = one_hot(3, ent_e.shape[1])
    n_t = _transfer_dtb(gather(ent_e, oh), gather(ent_t, oh), n_r_t)
    n_score = _l1_score_dtb(n_h, gather(rel_e, oh_nr), n_t)

    _emit_outputs(p_score, n_score, take_ref, out_ref, margin)


# ---------------------------------------------------------------------------
# Path 2 (fallback for huge tables): XLA gather of bf16 streams, fed to the
# kernel already in (groups, Dp, B) lane-dense layout.
# ---------------------------------------------------------------------------
def _transd_streams_kernel(take_ref, ent_e_ref, ent_t_ref, rel_e_ref, rel_t_ref,
                           out_ref, *, margin):
    """ent_*: (4, Dp, TB) rows stacked as [p_h, p_t, n_h, n_t]
       rel_*: (2, Dp, TB) rows stacked as [pos_r, neg_r]"""
    f32 = jnp.float32

    p_r_t = rel_t_ref[0].astype(f32)
    p_h = _transfer_dtb(ent_e_ref[0].astype(f32), ent_t_ref[0].astype(f32), p_r_t)
    p_t = _transfer_dtb(ent_e_ref[1].astype(f32), ent_t_ref[1].astype(f32), p_r_t)
    p_score = _l1_score_dtb(p_h, rel_e_ref[0].astype(f32), p_t)

    n_r_t = rel_t_ref[1].astype(f32)
    n_h = _transfer_dtb(ent_e_ref[2].astype(f32), ent_t_ref[2].astype(f32), n_r_t)
    n_t = _transfer_dtb(ent_e_ref[3].astype(f32), ent_t_ref[3].astype(f32), n_r_t)
    n_score = _l1_score_dtb(n_h, rel_e_ref[1].astype(f32), n_t)

    _emit_outputs(p_score, n_score, take_ref, out_ref, margin)


# ---------------------------------------------------------------------------
# Wrapper
# ---------------------------------------------------------------------------
def transd_forward(pos, neg, take, params, margin, *,
                   tile_rows=2048, table_dtype=jnp.bfloat16,
                   stream_dtype=jnp.bfloat16, fuse_gather=None,
                   max_fused_table_rows=1024):
    """pos / neg: tuples of (h_idx, r_idx, t_idx), each int (B,).  take: bool (B,).
       Returns (loss scalar, -_n_score (B,)).
       table_dtype / stream_dtype: dtype of the embedding values fed to the
       kernel (bf16 halves HBM traffic; kernel computes in f32).
    """
    ent_emb, rel_emb = params["ent_emb"], params["rel_emb"]
    ent_tr, rel_tr = params["ent_transfer"], params["rel_transfer"]
    pos_h, pos_r, pos_t = pos
    neg_h, neg_r, neg_t = neg

    B = pos_h.shape[0]
    D = ent_emb.shape[1]
    Dp = _round_up(D, 8)

    # Batch tile: multiple of 128 (lane-dense), large enough to amortize the
    # ~0.35 us per-grid-step overhead.  (Keep G >= 2 on v7x for megacore when
    # batches are large; for tiny batches a single tile is fine.)
    TB = max(128, min(_round_up(int(tile_rows), 128), _round_up(max(B, 1), 128)))
    Bp = _round_up(B, TB)
    G = Bp // TB

    if fuse_gather is None:
        fuse_gather = (ent_emb.shape[0] <= max_fused_table_rows
                       and rel_emb.shape[0] <= max_fused_table_rows)

    pad_i = lambda v: jnp.pad(v.astype(jnp.int32), (0, Bp - B))
    take_f = jnp.pad(take.astype(jnp.float32), (0, Bp - B)).reshape(1, Bp)

    out_shape = jax.ShapeDtypeStruct((G, 2, TB), jnp.float32)
    out_spec = pl.BlockSpec((1, 2, TB), lambda i: (i, 0, 0))
    take_spec = pl.BlockSpec((1, TB), lambda i: (0, i))
    cparams = pltpu.CompilerParams(dimension_semantics=("parallel",))

    if fuse_gather:
        # Indices stacked as [p_h, p_t, n_h, n_t, p_r, n_r] -> (6, Bp) int32.
        idx = jnp.stack([pad_i(pos_h), pad_i(pos_t), pad_i(neg_h),
                         pad_i(neg_t), pad_i(pos_r), pad_i(neg_r)], axis=0)

        er = _round_up(ent_emb.shape[0], 128)
        rr = _round_up(rel_emb.shape[0], 128)

        def prep_table(tbl, rows_p):
            t = jnp.pad(tbl, ((0, rows_p - tbl.shape[0]), (0, Dp - D)))
            return t.T.astype(table_dtype)                      # (Dp, rows_p)

        def table_spec(rows_p):
            return pl.BlockSpec((Dp, rows_p), lambda i: (0, 0))  # VMEM-resident

        out = pl.pallas_call(
            functools.partial(_transd_fused_kernel, margin=float(margin)),
            out_shape=out_shape,
            grid=(G,),
            in_specs=[pl.BlockSpec((6, TB), lambda i: (0, i)),
                      take_spec,
                      table_spec(er), table_spec(er),
                      table_spec(rr), table_spec(rr)],
            out_specs=out_spec,
            compiler_params=cparams,
        )(idx, take_f,
          prep_table(ent_emb, er), prep_table(ent_tr, er),
          prep_table(rel_emb, rr), prep_table(rel_tr, rr))
    else:
        # 4 stacked gathers instead of 12; streams fed lane-dense as (g, Dp, Bp).
        ent_idx = jnp.concatenate([pad_i(pos_h), pad_i(pos_t),
                                   pad_i(neg_h), pad_i(neg_t)])
        rel_idx = jnp.concatenate([pad_i(pos_r), pad_i(neg_r)])

        def gather_T(tbl, idxv, groups):
            g = jnp.take(tbl, idxv, axis=0).astype(stream_dtype)
            g = jnp.pad(g, ((0, 0), (0, Dp - D)))
            return jnp.swapaxes(g.reshape(groups, Bp, Dp), 1, 2)

        espec = pl.BlockSpec((4, Dp, TB), lambda i: (0, 0, i))
        rspec = pl.BlockSpec((2, Dp, TB), lambda i: (0, 0, i))

        out = pl.pallas_call(
            functools.partial(_transd_streams_kernel, margin=float(margin)),
            out_shape=out_shape,
            grid=(G,),
            in_specs=[take_spec, espec, espec, rspec, rspec],
            out_specs=out_spec,
            compiler_params=cparams,
        )(take_f,
          gather_T(ent_emb, ent_idx, 4), gather_T(ent_tr, ent_idx, 4),
          gather_T(rel_emb, rel_idx, 2), gather_T(rel_tr, rel_idx, 2))

    neg_score = out[:, 0, :].reshape(Bp)[:B]
    loss = jnp.sum(out[:, 1, :])
    return loss, neg_score


def xavier_uniform(key, shape):
    limit = jnp.sqrt(6.0 / (shape[0] + shape[1]))
    return jax.random.uniform(key, shape, jnp.float32, -limit, limit)


if __name__ == "__main__":
    key = jax.random.PRNGKey(0)
    ent_size, rel_size, latent_dim = 16, 8, 32
    B = 8
    margin = 1.0

    k = jax.random.split(key, 8)
    params = {
        "rel_emb":      xavier_uniform(k[0], (rel_size, latent_dim)),
        "ent_emb":      xavier_uniform(k[1], (ent_size, latent_dim)),
        "rel_transfer": xavier_uniform(k[2], (rel_size, latent_dim)),
        "ent_transfer": xavier_uniform(k[3], (ent_size, latent_dim)),
    }

    pos_h = jax.random.randint(k[4], (B,), 0, ent_size, jnp.int32)
    pos_t = jax.random.randint(k[5], (B,), 0, ent_size, jnp.int32)
    pos_r = jax.random.randint(k[6], (B,), 0, rel_size, jnp.int32)
    neg_h = (pos_h + 1) % ent_size
    neg_t = (pos_t + 3) % ent_size
    neg_r = pos_r
    take = jax.random.bernoulli(k[7], 0.5, (B,))

    pos = (pos_h, pos_r, pos_t)
    neg = (neg_h, neg_r, neg_t)

    # Default path: VMEM-resident tables + in-kernel MXU gather.
    loss_f, ns_f = transd_forward(pos, neg, take, params, margin)
    # Fallback path: XLA gather of bf16 streams (what large tables would use).
    loss_s, ns_s = transd_forward(pos, neg, take, params, margin,
                                  fuse_gather=False)
    jax.block_until_ready((loss_f, ns_f, loss_s, ns_s))

    # Plain-JAX reference (torch semantics).  Embedding values are quantized to
    # the same bf16 the kernel streams/gathers in, so the check isolates the
    # kernel math (set table_dtype/stream_dtype=jnp.float32 for exact f32).
    def reference(qdtype):
        qt = lambda n: params[n].astype(qdtype).astype(jnp.float32)
        ee, re_, et, rt = qt("ent_emb"), qt("rel_emb"), qt("ent_transfer"), qt("rel_transfer")
        g = lambda tbl, i: jnp.take(tbl, i, axis=0)

        def tr(e, t, r):
            p = e + jnp.sum(e * t, -1, keepdims=True) * r
            return p / jnp.maximum(jnp.linalg.norm(p, axis=-1, keepdims=True), 1e-12)

        p_h = tr(g(ee, pos_h), g(et, pos_h), g(rt, pos_r))
        p_t = tr(g(ee, pos_t), g(et, pos_t), g(rt, pos_r))
        n_h = tr(g(ee, neg_h), g(et, neg_h), g(rt, neg_r))
        n_t = tr(g(ee, neg_t), g(et, neg_t), g(rt, neg_r))
        ps = jnp.sum(jnp.abs(p_h + g(re_, pos_r) - p_t), -1)
        ns = jnp.sum(jnp.abs(n_h + g(re_, neg_r) - n_t), -1)
        loss = jnp.sum(jnp.where(take, jnp.maximum(ps - ns + margin, 0.0), 0.0))
        return loss, -ns

    ref_loss, ref_ns = reference(jnp.bfloat16)
    for loss, ns in ((loss_f, ns_f), (loss_s, ns_s)):
        assert jnp.allclose(loss, ref_loss, rtol=5e-4, atol=2e-3), (loss, ref_loss)
        assert jnp.allclose(ns, ref_ns, rtol=5e-4, atol=5e-4), (ns, ref_ns)

    print("KERNEL_OK")
</pallas_src>

<mosaic_0001>
module attributes {stable_mosaic.version = 11 : i64} {
  func.func @_transd_fused_kernel(%arg0: i32, %arg1: memref<6x128xi32, #tpu.memory_space<vmem>>, %arg2: memref<1x128xf32, #tpu.memory_space<vmem>>, %arg3: memref<32x128xbf16, #tpu.memory_space<vmem>>, %arg4: memref<32x128xbf16, #tpu.memory_space<vmem>>, %arg5: memref<32x128xbf16, #tpu.memory_space<vmem>>, %arg6: memref<32x128xbf16, #tpu.memory_space<vmem>>, %arg7: memref<1x2x128xf32, #tpu.memory_space<vmem>>) attributes {dimension_semantics = [#tpu.dimension_semantics<parallel>], iteration_bounds = array<i64: 1>, scalar_prefetch = 0 : i64, scratch_operands = 0 : i64, tpu.core_type = #tpu.core_type<tc>, window_params = [{transform_indices = @transform_0, window_bounds = array<i64: 6, 128>}, {transform_indices = @transform_1, window_bounds = array<i64: 1, 128>}, {pipeline_mode = #tpu.pipeline_mode<synchronous>, transform_indices = @transform_2, window_bounds = array<i64: 32, 128>}, {pipeline_mode = #tpu.pipeline_mode<synchronous>, transform_indices = @transform_3, window_bounds = array<i64: 32, 128>}, {pipeline_mode = #tpu.pipeline_mode<synchronous>, transform_indices = @transform_4, window_bounds = array<i64: 32, 128>}, {pipeline_mode = #tpu.pipeline_mode<synchronous>, transform_indices = @transform_5, window_bounds = array<i64: 32, 128>}, {transform_indices = @transform_6, window_bounds = array<i64: 1, 2, 128>}]} {
    %c0 = arith.constant 0 : index
    %c0_0 = arith.constant 0 : index
    %0 = vector.load %arg1[%c0, %c0_0] : memref<6x128xi32, #tpu.memory_space<vmem>>, vector<6x128xi32>
    %c0_1 = arith.constant 0 : index
    %c0_2 = arith.constant 0 : index
    %1 = vector.load %arg3[%c0_1, %c0_2] : memref<32x128xbf16, #tpu.memory_space<vmem>>, vector<32x128xbf16>
    %c0_3 = arith.constant 0 : index
    %c0_4 = arith.constant 0 : index
    %2 = vector.load %arg4[%c0_3, %c0_4] : memref<32x128xbf16, #tpu.memory_space<vmem>>, vector<32x128xbf16>
    %c0_5 = arith.constant 0 : index
    %c0_6 = arith.constant 0 : index
    %3 = vector.load %arg5[%c0_5, %c0_6] : memref<32x128xbf16, #tpu.memory_space<vmem>>, vector<32x128xbf16>
    %c0_7 = arith.constant 0 : index
    %c0_8 = arith.constant 0 : index
    %4 = vector.load %arg6[%c0_7, %c0_8] : memref<32x128xbf16, #tpu.memory_space<vmem>>, vector<32x128xbf16>
    %5 = vector.extract_strided_slice %0 {offsets = [4, 0], sizes = [1, 128], strides = [1, 1]} : vector<6x128xi32> to vector<1x128xi32>
    %6 = tpu.iota {dimensions = array<i32: 0>} : vector<128x128xi32>
    %7 = vector.broadcast %5 : vector<1x128xi32> to vector<128x128xi32>
    %8 = arith.cmpi eq, %6, %7 : vector<128x128xi32>
    %cst = arith.constant 1.000000e+00 : f32
    %cst_9 = arith.constant 0.000000e+00 : f32
    %9 = vector.broadcast %cst : f32 to vector<128x128xf32>
    %10 = vector.broadcast %cst_9 : f32 to vector<128x128xf32>
    %11 = arith.select %8, %9, %10 : vector<128x128xi1>, vector<128x128xf32>
    %12 = arith.truncf %11 : vector<128x128xf32> to vector<128x128xbf16>
    %cst_10 = arith.constant dense<0.000000e+00> : vector<32x128xf32>
    %13 = tpu.matmul %4, %12, %cst_10 {dimension_numbers = #tpu.dot_dimension_numbers<[1], [0], [0], [1], [0, 0, 1, 1], [], []>} : vector<32x128xbf16>, vector<128x128xbf16>, vector<32x128xf32> -> vector<32x128xf32>
    %14 = vector.extract_strided_slice %0 {offsets = [0, 0], sizes = [1, 128], strides = [1, 1]} : vector<6x128xi32> to vector<1x128xi32>
    %15 = tpu.iota {dimensions = array<i32: 0>} : vector<128x128xi32>
    %16 = vector.broadcast %14 : vector<1x128xi32> to vector<128x128xi32>
    %17 = arith.cmpi eq, %15, %16 : vector<128x128xi32>
    %cst_11 = arith.constant 1.000000e+00 : f32
    %cst_12 = arith.constant 0.000000e+00 : f32
    %18 = vector.broadcast %cst_11 : f32 to vector<128x128xf32>
    %19 = vector.broadcast %cst_12 : f32 to vector<128x128xf32>
    %20 = arith.select %17, %18, %19 : vector<128x128xi1>, vector<128x128xf32>
    %21 = arith.truncf %20 : vector<128x128xf32> to vector<128x128xbf16>
    %cst_13 = arith.constant dense<0.000000e+00> : vector<32x128xf32>
    %22 = tpu.matmul %1, %21, %cst_13 {dimension_numbers = #tpu.dot_dimension_numbers<[1], [0], [0], [1], [0, 0, 1, 1], [], []>} : vector<32x128xbf16>, vector<128x128xbf16>, vector<32x128xf32> -> vector<32x128xf32>
    %cst_14 = arith.constant dense<0.000000e+00> : vector<32x128xf32>
    %23 = tpu.matmul %2, %21, %cst_14 {dimension_numbers = #tpu.dot_dimension_numbers<[1], [0], [0], [1], [0, 0, 1, 1], [], []>} : vector<32x128xbf16>, vector<128x128xbf16>, vector<32x128xf32> -> vector<32x128xf32>
    %24 = arith.mulf %22, %23 : vector<32x128xf32>
    %cst_15 = arith.constant dense<0.000000e+00> : vector<128xf32>
    %25 = vector.multi_reduction <add>, %24, %cst_15 [0] : vector<32x128xf32> to vector<128xf32>
    %26 = vector.shape_cast %25 : vector<128xf32> to vector<1x128xf32>
    %27 = vector.broadcast %26 : vector<1x128xf32> to vector<32x128xf32>
    %28 = arith.mulf %27, %13 : vector<32x128xf32>
    %29 = arith.addf %22, %28 : vector<32x128xf32>
    %30 = arith.mulf %29, %29 : vector<32x128xf32>
    %cst_16 = arith.constant dense<0.000000e+00> : vector<128xf32>
    %31 = vector.multi_reduction <add>, %30, %cst_16 [0] : vector<32x128xf32> to vector<128xf32>
    %32 = vector.shape_cast %31 : vector<128xf32> to vector<1x128xf32>
    %cst_17 = arith.constant 1.000000e-24 : f32
    %33 = vector.broadcast %cst_17 : f32 to vector<1x128xf32>
    %34 = arith.maximumf %32, %33 : vector<1x128xf32>
    %35 = math.rsqrt %34 : vector<1x128xf32>
    %36 = vector.broadcast %35 : vector<1x128xf32> to vector<32x128xf32>
    %37 = arith.mulf %29, %36 : vector<32x128xf32>
    %38 = vector.extract_strided_slice %0 {offsets = [1, 0], sizes = [1, 128], strides = [1, 1]} : vector<6x128xi32> to vector<1x128xi32>
    %39 = tpu.iota {dimensions = array<i32: 0>} : vector<128x128xi32>
    %40 = vector.broadcast %38 : vector<1x128xi32> to vector<128x128xi32>
    %41 = arith.cmpi eq, %39, %40 : vector<128x128xi32>
    %cst_18 = arith.constant 1.000000e+00 : f32
    %cst_19 = arith.constant 0.000000e+00 : f32
    %42 = vector.broadcast %cst_18 : f32 to vector<128x128xf32>
    %43 = vector.broadcast %cst_19 : f32 to vector<128x128xf32>
    %44 = arith.select %41, %42, %43 : vector<128x128xi1>, vector<128x128xf32>
    %45 = arith.truncf %44 : vector<128x128xf32> to vector<128x128xbf16>
    %cst_20 = arith.constant dense<0.000000e+00> : vector<32x128xf32>
    %46 = tpu.matmul %1, %45, %cst_20 {dimension_numbers = #tpu.dot_dimension_numbers<[1], [0], [0], [1], [0, 0, 1, 1], [], []>} : vector<32x128xbf16>, vector<128x128xbf16>, vector<32x128xf32> -> vector<32x128xf32>
    %cst_21 = arith.constant dense<0.000000e+00> : vector<32x128xf32>
    %47 = tpu.matmul %2, %45, %cst_21 {dimension_numbers = #tpu.dot_dimension_numbers<[1], [0], [0], [1], [0, 0, 1, 1], [], []>} : vector<32x128xbf16>, vector<128x128xbf16>, vector<32x128xf32> -> vector<32x128xf32>
    %48 = arith.mulf %46, %47 : vector<32x128xf32>
    %cst_22 = arith.constant dense<0.000000e+00> : vector<128xf32>
    %49 = vector.multi_reduction <add>, %48, %cst_22 [0] : vector<32x128xf32> to vector<128xf32>
    %50 = vector.shape_cast %49 : vector<128xf32> to vector<1x128xf32>
    %51 = vector.broadcast %50 : vector<1x128xf32> to vector<32x128xf32>
    %52 = arith.mulf %51, %13 : vector<32x128xf32>
    %53 = arith.addf %46, %52 : vector<32x128xf32>
    %54 = arith.mulf %53, %53 : vector<32x128xf32>
    %cst_23 = arith.constant dense<0.000000e+00> : vector<128xf32>
    %55 = vector.multi_reduction <add>, %54, %cst_23 [0] : vector<32x128xf32> to vector<128xf32>
    %56 = vector.shape_cast %55 : vector<128xf32> to vector<1x128xf32>
    %cst_24 = arith.constant 1.000000e-24 : f32
    %57 = vector.broadcast %cst_24 : f32 to vector<1x128xf32>
    %58 = arith.maximumf %56, %57 : vector<1x128xf32>
    %59 = math.rsqrt %58 : vector<1x128xf32>
    %60 = vector.broadcast %59 : vector<1x128xf32> to vector<32x128xf32>
    %61 = arith.mulf %53, %60 : vector<32x128xf32>
    %cst_25 = arith.constant dense<0.000000e+00> : vector<32x128xf32>
    %62 = tpu.matmul %3, %12, %cst_25 {dimension_numbers = #tpu.dot_dimension_numbers<[1], [0], [0], [1], [0, 0, 1, 1], [], []>} : vector<32x128xbf16>, vector<128x128xbf16>, vector<32x128xf32> -> vector<32x128xf32>
    %63 = arith.addf %37, %62 : vector<32x128xf32>
    %64 = arith.subf %63, %61 : vector<32x128xf32>
    %65 = math.absf %64 : vector<32x128xf32>
    %cst_26 = arith.constant dense<0.000000e+00> : vector<128xf32>
    %66 = vector.multi_reduction <add>, %65, %cst_26 [0] : vector<32x128xf32> to vector<128xf32>
    %67 = vector.shape_cast %66 : vector<128xf32> to vector<1x128xf32>
    %68 = vector.extract_strided_slice %0 {offsets = [5, 0], sizes = [1, 128], strides = [1, 1]} : vector<6x128xi32> to vector<1x128xi32>
    %69 = tpu.iota {dimensions = array<i32: 0>} : vector<128x128xi32>
    %70 = vector.broadcast %68 : vector<1x128xi32> to vector<128x128xi32>
    %71 = arith.cmpi eq, %69, %70 : vector<128x128xi32>
    %cst_27 = arith.constant 1.000000e+00 : f32
    %cst_28 = arith.constant 0.000000e+00 : f32
    %72 = vector.broadcast %cst_27 : f32 to vector<128x128xf32>
    %73 = vector.broadcast %cst_28 : f32 to vector<128x128xf32>
    %74 = arith.select %71, %72, %73 : vector<128x128xi1>, vector<128x128xf32>
    %75 = arith.truncf %74 : vector<128x128xf32> to vector<128x128xbf16>
    %cst_29 = arith.constant dense<0.000000e+00> : vector<32x128xf32>
    %76 = tpu.matmul %4, %75, %cst_29 {dimension_numbers = #tpu.dot_dimension_numbers<[1], [0], [0], [1], [0, 0, 1, 1], [], []>} : vector<32x128xbf16>, vector<128x128xbf16>, vector<32x128xf32> -> vector<32x128xf32>
    %77 = vector.extract_strided_slice %0 {offsets = [2, 0], sizes = [1, 128], strides = [1, 1]} : vector<6x128xi32> to vector<1x128xi32>
    %78 = tpu.iota {dimensions = array<i32: 0>} : vector<128x128xi32>
    %79 = vector.broadcast %77 : vector<1x128xi32> to vector<128x128xi32>
    %80 = arith.cmpi eq, %78, %79 : vector<128x128xi32>
    %cst_30 = arith.constant 1.000000e+00 : f32
    %cst_31 = arith.constant 0.000000e+00 : f32
    %81 = vector.broadcast %cst_30 : f32 to vector<128x128xf32>
    %82 = vector.broadcast %cst_31 : f32 to vector<128x128xf32>
    %83 = arith.select %80, %81, %82 : vector<128x128xi1>, vector<128x128xf32>
    %84 = arith.truncf %83 : vector<128x128xf32> to vector<128x128xbf16>
    %cst_32 = arith.constant dense<0.000000e+00> : vector<32x128xf32>
    %85 = tpu.matmul %1, %84, %cst_32 {dimension_numbers = #tpu.dot_dimension_numbers<[1], [0], [0], [1], [0, 0, 1, 1], [], []>} : vector<32x128xbf16>, vector<128x128xbf16>, vector<32x128xf32> -> vector<32x128xf32>
    %cst_33 = arith.constant dense<0.000000e+00> : vector<32x128xf32>
    %86 = tpu.matmul %2, %84, %cst_33 {dimension_numbers = #tpu.dot_dimension_numbers<[1], [0], [0], [1], [0, 0, 1, 1], [], []>} : vector<32x128xbf16>, vector<128x128xbf16>, vector<32x128xf32> -> vector<32x128xf32>
    %87 = arith.mulf %85, %86 : vector<32x128xf32>
    %cst_34 = arith.constant dense<0.000000e+00> : vector<128xf32>
    %88 = vector.multi_reduction <add>, %87, %cst_34 [0] : vector<32x128xf32> to vector<128xf32>
    %89 = vector.shape_cast %88 : vector<128xf32> to vector<1x128xf32>
    %90 = vector.broadcast %89 : vector<1x128xf32> to vector<32x128xf32>
    %91 = arith.mulf %90, %76 : vector<32x128xf32>
    %92 = arith.addf %85, %91 : vector<32x128xf32>
    %93 = arith.mulf %92, %92 : vector<32x128xf32>
    %cst_35 = arith.constant dense<0.000000e+00> : vector<128xf32>
    %94 = vector.multi_reduction <add>, %93, %cst_35 [0] : vector<32x128xf32> to vector<128xf32>
    %95 = vector.shape_cast %94 : vector<128xf32> to vector<1x128xf32>
    %cst_36 = arith.constant 1.000000e-24 : f32
    %96 = vector.broadcast %cst_36 : f32 to vector<1x128xf32>
    %97 = arith.maximumf %95, %96 : vector<1x128xf32>
    %98 = math.rsqrt %97 : vector<1x128xf32>
    %99 = vector.broadcast %98 : vector<1x128xf32> to vector<32x128xf32>
    %100 = arith.mulf %92, %99 : vector<32x128xf32>
    %101 = vector.extract_strided_slice %0 {offsets = [3, 0], sizes = [1, 128], strides = [1, 1]} : vector<6x128xi32> to vector<1x128xi32>
    %102 = tpu.iota {dimensions = array<i32: 0>} : vector<128x128xi32>
    %103 = vector.broadcast %101 : vector<1x128xi32> to vector<128x128xi32>
    %104 = arith.cmpi eq, %102, %103 : vector<128x128xi32>
    %cst_37 = arith.constant 1.000000e+00 : f32
    %cst_38 = arith.constant 0.000000e+00 : f32
    %105 = vector.broadcast %cst_37 : f32 to vector<128x128xf32>
    %106 = vector.broadcast %cst_38 : f32 to vector<128x128xf32>
    %107 = arith.select %104, %105, %106 : vector<128x128xi1>, vector<128x128xf32>
    %108 = arith.truncf %107 : vector<128x128xf32> to vector<128x128xbf16>
    %cst_39 = arith.constant dense<0.000000e+00> : vector<32x128xf32>
    %109 = tpu.matmul %1, %108, %cst_39 {dimension_numbers = #tpu.dot_dimension_numbers<[1], [0], [0], [1], [0, 0, 1, 1], [], []>} : vector<32x128xbf16>, vector<128x128xbf16>, vector<32x128xf32> -> vector<32x128xf32>
    %cst_40 = arith.constant dense<0.000000e+00> : vector<32x128xf32>
    %110 = tpu.matmul %2, %108, %cst_40 {dimension_numbers = #tpu.dot_dimension_numbers<[1], [0], [0], [1], [0, 0, 1, 1], [], []>} : vector<32x128xbf16>, vector<128x128xbf16>, vector<32x128xf32> -> vector<32x128xf32>
    %111 = arith.mulf %109, %110 : vector<32x128xf32>
    %cst_41 = arith.constant dense<0.000000e+00> : vector<128xf32>
    %112 = vector.multi_reduction <add>, %111, %cst_41 [0] : vector<32x128xf32> to vector<128xf32>
    %113 = vector.shape_cast %112 : vector<128xf32> to vector<1x128xf32>
    %114 = vector.broadcast %113 : vector<1x128xf32> to vector<32x128xf32>
    %115 = arith.mulf %114, %76 : vector<32x128xf32>
    %116 = arith.addf %109, %115 : vector<32x128xf32>
    %117 = arith.mulf %116, %116 : vector<32x128xf32>
    %cst_42 = arith.constant dense<0.000000e+00> : vector<128xf32>
    %118 = vector.multi_reduction <add>, %117, %cst_42 [0] : vector<32x128xf32> to vector<128xf32>
    %119 = vector.shape_cast %118 : vector<128xf32> to vector<1x128xf32>
    %cst_43 = arith.constant 1.000000e-24 : f32
    %120 = vector.broadcast %cst_43 : f32 to vector<1x128xf32>
    %121 = arith.maximumf %119, %120 : vector<1x128xf32>
    %122 = math.rsqrt %121 : vector<1x128xf32>
    %123 = vector.broadcast %122 : vector<1x128xf32> to vector<32x128xf32>
    %124 = arith.mulf %116, %123 : vector<32x128xf32>
    %cst_44 = arith.constant dense<0.000000e+00> : vector<32x128xf32>
    %125 = tpu.matmul %3, %75, %cst_44 {dimension_numbers = #tpu.dot_dimension_numbers<[1], [0], [0], [1], [0, 0, 1, 1], [], []>} : vector<32x128xbf16>, vector<128x128xbf16>, vector<32x128xf32> -> vector<32x128xf32>
    %126 = arith.addf %100, %125 : vector<32x128xf32>
    %127 = arith.subf %126, %124 : vector<32x128xf32>
    %128 = math.absf %127 : vector<32x128xf32>
    %cst_45 = arith.constant dense<0.000000e+00> : vector<128xf32>
    %129 = vector.multi_reduction <add>, %128, %cst_45 [0] : vector<32x128xf32> to vector<128xf32>
    %130 = vector.shape_cast %129 : vector<128xf32> to vector<1x128xf32>
    %c0_46 = arith.constant 0 : index
    %c0_47 = arith.constant 0 : index
    %131 = vector.load %arg2[%c0_46, %c0_47] : memref<1x128xf32, #tpu.memory_space<vmem>>, vector<1x128xf32>
    %cst_48 = arith.constant 0.000000e+00 : f32
    %132 = vector.broadcast %cst_48 : f32 to vector<1x128xf32>
    %133 = arith.subf %132, %130 : vector<1x128xf32>
    %c0_49 = arith.constant 0 : index
    %c0_50 = arith.constant 0 : index
    %c0_51 = arith.constant 0 : index
    %134 = vector.load %arg7[%c0_49, %c0_50, %c0_51] : memref<1x2x128xf32, #tpu.memory_space<vmem>>, vector<1x1x128xf32>
    %135 = vector.shape_cast %134 : vector<1x1x128xf32> to vector<1x128xf32>
    %136 = vector.shape_cast %133 : vector<1x128xf32> to vector<1x1x128xf32>
    tpu.vector_store %arg7[%c0_49, %c0_50, %c0_51], %136 {strides = array<i32>} : memref<1x2x128xf32, #tpu.memory_space<vmem>>, vector<1x1x128xf32>,
    %137 = arith.subf %67, %130 : vector<1x128xf32>
    %cst_52 = arith.constant 1.000000e+00 : f32
    %138 = vector.broadcast %cst_52 : f32 to vector<1x128xf32>
    %139 = arith.addf %137, %138 : vector<1x128xf32>
    %cst_53 = arith.constant 0.000000e+00 : f32
    %140 = vector.broadcast %cst_53 : f32 to vector<1x128xf32>
    %141 = arith.maximumf %139, %140 : vector<1x128xf32>
    %142 = arith.mulf %131, %141 : vector<1x128xf32>
    %c0_54 = arith.constant 0 : index
    %c1 = arith.constant 1 : index
    %c0_55 = arith.constant 0 : index
    %143 = vector.load %arg7[%c0_54, %c1, %c0_55] : memref<1x2x128xf32, #tpu.memory_space<vmem>>, vector<1x1x128xf32>
    %144 = vector.shape_cast %143 : vector<1x1x128xf32> to vector<1x128xf32>
    %145 = vector.shape_cast %142 : vector<1x128xf32> to vector<1x1x128xf32>
    tpu.vector_store %arg7[%c0_54, %c1, %c0_55], %145 {strides = array<i32>} : memref<1x2x128xf32, #tpu.memory_space<vmem>>, vector<1x1x128xf32>,
    return
  }
  func.func @transform_0(%arg0: i32) -> (i32, i32) {
    %c0_i32 = arith.constant 0 : i32
    %c0_i32_0 = arith.constant 0 : i32
    return %c0_i32, %arg0 : i32, i32
  }
  func.func @transform_1(%arg0: i32) -> (i32, i32) {
    %c0_i32 = arith.constant 0 : i32
    %c0_i32_0 = arith.constant 0 : i32
    return %c0_i32, %arg0 : i32, i32
  }
  func.func @transform_2(%arg0: i32) -> (i32, i32) {
    %c0_i32 = arith.constant 0 : i32
    %c0_i32_0 = arith.constant 0 : i32
    %c0_i32_1 = arith.constant 0 : i32
    return %c0_i32, %c0_i32_0 : i32, i32
  }
  func.func @transform_3(%arg0: i32) -> (i32, i32) {
    %c0_i32 = arith.constant 0 : i32
    %c0_i32_0 = arith.constant 0 : i32
    %c0_i32_1 = arith.constant 0 : i32
    return %c0_i32, %c0_i32_0 : i32, i32
  }
  func.func @transform_4(%arg0: i32) -> (i32, i32) {
    %c0_i32 = arith.constant 0 : i32
    %c0_i32_0 = arith.constant 0 : i32
    %c0_i32_1 = arith.constant 0 : i32
    return %c0_i32, %c0_i32_0 : i32, i32
  }
  func.func @transform_5(%arg0: i32) -> (i32, i32) {
    %c0_i32 = arith.constant 0 : i32
    %c0_i32_0 = arith.constant 0 : i32
    %c0_i32_1 = arith.constant 0 : i32
    return %c0_i32, %c0_i32_0 : i32, i32
  }
  func.func @transform_6(%arg0: i32) -> (i32, i32, i32) {
    %c0_i32 = arith.constant 0 : i32
    %c0_i32_0 = arith.constant 0 : i32
    %c0_i32_1 = arith.constant 0 : i32
    return %arg0, %c0_i32, %c0_i32_0 : i32, i32, i32
  }
}

</mosaic_0001>

<bundles_post_ra>
// kernel: tpu_custom_call.1
= control target key start
LH: loop header
LB: loop body
LE: loop exit
PB: predicated region body
PF: predicated region fallthrough
CT: control target
= control target key end

     0   :  { %11 = vsyncpa [#allocation3], 0  ;;  %s2257_s0 = inlined_call_operand.hbm [shape: s32[6,128], index: 0, kind: input, shape index: {}]   ;;  %s2258_s1 = inlined_call_operand.hbm [shape: f32[1,128], index: 1, kind: input, shape index: {}]   ;;  %s2259_s2 = inlined_call_operand.hbm [shape: bf16[32,128], index: 2, kind: input, shape index: {}]   ;;  %s2260_s3 = inlined_call_operand.hbm [shape: bf16[32,128], index: 3, kind: input, shape index: {}]   ;;  %s2261_s4 = inlined_call_operand.hbm [shape: bf16[32,128], index: 4, kind: input, shape index: {}]   ;;  %s2262_s5 = inlined_call_operand.hbm [shape: bf16[32,128], index: 5, kind: input, shape index: {}]   ;;  %s2263_s6 = inlined_call_operand.hbm [shape: f32[1,2,128], index: 6, kind: output, shape index: {}]  }
   0x1   :  { %12 = vsyncpa [#allocation6], 0 }
   0x2   :  { %13 = vsyncpa [#allocation9], 0 }
   0x3   :  { %14 = vsyncpa [#allocation12], 0  ;;  %s32_s23 = sshll.u32 %s2258_s1, 4  ;;  %s33_s23 = int_to_ptr.hbm [resolvable:$true] %s32_s23 }
   0x4   :  { %15 = vsyncpa [#allocation4], 0  ;;  %s1364_s24 = smov [#allocation5]   ;;  %s55_s28 = sshll.u32 %s2260_s3, 4  ;;  %s56_s28 = int_to_ptr.hbm [resolvable:$true] %s55_s28 }
   0x5   :  { %s34_s25 = sshll.u32 %s1364_s24, 4  ;;  %s1365_s29 = smov [#allocation8]   ;;  %s35_s25 = int_to_ptr.vmem [resolvable:$true] %s34_s25 }
   0x6   :  { %37 = dma.hbm_to_vmem [thread:$0]  %s33_s23, 16, %s35_s25, [#allocation6]  }
   0x7   :  { %s57_s30 = sshll.u32 %s1365_s29, 4  ;;  %s21_s9 = sshll.u32 %s2257_s0, 4  ;;  %s58_s30 = int_to_ptr.vmem [resolvable:$true] %s57_s30  ;;  %s22_s9 = int_to_ptr.hbm [resolvable:$true] %s21_s9 }
   0x8   :  { %s1366_s1 = smov 64   ;;  %s1367_s10 = smov 4  }
   0x9   :  { %63 = dma.hbm_to_vmem [thread:$0]  %s56_s28, 256, %s58_s30, [#allocation9], %s1366_s1, %s1366_s1, %s1367_s10  }
   0xa   :  { %s42_s13 = sshll.u32 %s2259_s2, 4  ;;  %s1368_s14 = smov [#allocation2]   ;;  %s43_s13 = int_to_ptr.hbm [resolvable:$true] %s42_s13 }
   0xb   :  { %s23_s15 = sshll.u32 %s1368_s14, 4  ;;  %s1369_s3 = smov [#allocation7]   ;;  %s24_s15 = int_to_ptr.vmem [resolvable:$true] %s23_s15 }
   0xc   :  { %26 = dma.hbm_to_vmem [thread:$0]  %s22_s9, 128, %s24_s15, [#allocation3]  }
   0xd   :  { %s44_s16 = sshll.u32 %s1369_s3, 4  ;;  %s68_s0 = sshll.u32 %s2261_s4, 4  ;;  %s45_s16 = int_to_ptr.vmem [resolvable:$true] %s44_s16  ;;  %s69_s0 = int_to_ptr.hbm [resolvable:$true] %s68_s0 }
   0xe   :  { %50 = dma.hbm_to_vmem [thread:$0]  %s43_s13, 256, %s45_s16, [#allocation6], %s1366_s1, %s1366_s1, %s1367_s10  }
   0xf   :  { %s81_s21 = sshll.u32 %s2262_s5, 4  ;;  %s1370_s22 = smov [#allocation10]   ;;  %s82_s21 = int_to_ptr.hbm [resolvable:$true] %s81_s21 }
  0x10   :  { %s70_s2 = sshll.u32 %s1370_s22, 4  ;;  %s1371_s23 = smov [#allocation11]   ;;  %s71_s2 = int_to_ptr.vmem [resolvable:$true] %s70_s2 }
  0x11   :  { %76 = dma.hbm_to_vmem [thread:$0]  %s69_s0, 256, %s71_s2, [#allocation9], %s1366_s1, %s1366_s1, %s1367_s10  }
  0x12   :  { %s83_s24 = sshll.u32 %s1371_s23, 4  ;;  %s84_s24 = int_to_ptr.vmem [resolvable:$true] %s83_s24 }
  0x13   :  { %89 = dma.hbm_to_vmem [thread:$0]  %s82_s21, 256, %s84_s24, [#allocation12], %s1366_s1, %s1366_s1, %s1367_s10  }
  0x14   :  { %1354 = dma.done.wait [#allocation3], 128  }
  0x15   :  { %1355 = vsyncadd [#allocation3], 4294967168 }
  0x16   :  { %1356 = dma.done.wait [#allocation6], 272  }
  0x17   :  { %1357 = vsyncadd [#allocation6], 4294967024 }
  0x18   :  { %1358 = dma.done.wait [#allocation9], 512  }
  0x19   :  { %1359 = vsyncadd [#allocation9], 4294966784 }
  0x1a   :  { %1360 = dma.done.wait [#allocation12], 256  }
  0x1b   :  { %1361 = vsyncadd [#allocation12], 4294967040  ;;  %v131_v0 = vlaneseq  ;;  %v1435_v4 = vld [vmem:[#allocation2] sm:$0x3f]  ;;  %v1372_v12 = vmov 1.0|1.0  }
  0x1c   :  { %v1444_v7 = vperm.slane %v1435_v4, 4  ;;  %v1447_v8 = vperm.slane %v1435_v4, 0  ;;  %v2283_v13 = vmov 0  ;;  %v1502_v16 = vperm.slane %v1435_v4, 1  ;;  %v1675_v36 = vld [vmem:[#allocation11] sm:$0xff]  ;;  %v1688_v38 = vld [vmem:[#allocation7] sm:$0xff] }
  0x1d   :  { %v1427_v1 = vshrl.u32 %v131_v0, 7  ;;  %v2285_v17 = vmov 0  ;;  %v2287_v20 = vmov 0  ;;  %v2291_v24 = vmov 0  ;;  %v1690_v39 = vld [vmem:[#allocation8] sm:$0xff]  ;;  %v1804_v48 = vld [vmem:[#allocation11 + $0x8] sm:$0xff] }
  0x1e   :  { %v2295_v28 = vmov 0  ;;  %v2297_v30 = vmov 0  ;;  %v2299_v31 = vmov 0  ;;  %v1635_v32 = vperm.slane %v1435_v4, 5  ;;  %v1817_v50 = vld [vmem:[#allocation7 + $0x8] sm:$0xff]  ;;  %v1819_v51 = vld [vmem:[#allocation8 + $0x8] sm:$0xff] }
  0x1f   :  { %v1430_v2 = vadd.s32 112, %v1427_v1  ;;  %v1433_v3 = vadd.s32 120, %v1427_v1  ;;  %v1438_v5 = vadd.s32 96, %v1427_v1  ;;  %v1441_v6 = vadd.s32 104, %v1427_v1  ;;  %v1934_v60 = vld [vmem:[#allocation10] sm:$0xff]  ;;  %s1373_s4 = smov [#allocation13]  }
  0x20   :  { %v1450_v9 = vadd.s32 80, %v1427_v1  ;;  %v1453_v10 = vadd.s32 88, %v1427_v1  ;;  %v1489_v14 = vadd.s32 64, %v1427_v1  ;;  %v1492_v15 = vadd.s32 72, %v1427_v1  ;;  %s921_s5 = sshll.u32 %s1373_s4, 4  ;;  %s923_s27 = sshll.u32 %s2263_s6, 4  ;;  %s922_s5 = int_to_ptr.vmem [resolvable:$true] %s921_s5  ;;  %s924_s27 = int_to_ptr.hbm [resolvable:$true] %s923_s27 }
  0x21   :  { %vm163_vm0 = vcmp.eq.s32.totalorder %v1430_v2, %v1444_v7  ;;  %vm164_vm1 = vcmp.eq.s32.totalorder %v1433_v3, %v1444_v7  ;;  %vm235_vm2 = vcmp.eq.s32.totalorder %v1430_v2, %v1447_v8  ;;  %vm236_vm3 = vcmp.eq.s32.totalorder %v1433_v3, %v1447_v8 }
  0x22   :  { %vm1463_vm4 = vmpackc.low %vm164_vm1, %vm163_vm0  ;;  %vm161_vm5 = vcmp.eq.s32.totalorder %v1438_v5, %v1444_v7  ;;  %vm162_vm6 = vcmp.eq.s32.totalorder %v1441_v6, %v1444_v7  ;;  %vm233_vm7 = vcmp.eq.s32.totalorder %v1438_v5, %v1447_v8  ;;  %vm234_vm8 = vcmp.eq.s32.totalorder %v1441_v6, %v1447_v8 }
  0x23   :  { %945 = vmatpush.bf16.msk.msra.mxu0 %vm1463_vm4, %v1372_v12  ;;  %vm968_vm9 = vmpackc.low %vm236_vm3, %vm235_vm2  ;;  %vm159_vm12 = vcmp.eq.s32.totalorder %v1450_v9, %v1444_v7  ;;  %vm160_vm13 = vcmp.eq.s32.totalorder %v1453_v10, %v1444_v7  ;;  %vm231_vm14 = vcmp.eq.s32.totalorder %v1450_v9, %v1447_v8  ;;  %vm232_vm15 = vcmp.eq.s32.totalorder %v1453_v10, %v1447_v8 }
  0x24   :  { %969 = vmatpush.bf16.msk.msra.mxu1 %vm968_vm9, %v1372_v12  ;;  %993 = vmatpush.bf16.msk.msra.mxu2 %vm968_vm9, %v1372_v12  ;;  %vm1480_vm10 = vmpackc.low %vm162_vm6, %vm161_vm5  ;;  %v1511_v18 = vadd.s32 48, %v1427_v1  ;;  %v1514_v19 = vadd.s32 56, %v1427_v1  ;;  %vm157_vm2 = vcmp.eq.s32.totalorder %v1489_v14, %v1444_v7  ;;  %vm158_vm3 = vcmp.eq.s32.totalorder %v1492_v15, %v1444_v7 }
  0x25   :  { %v2284_v13 = vsel %vm1480_vm10, 4294967295, %v2283_v13  ;;  %vm970_vm11 = vmpackc.low %vm234_vm8, %vm233_vm7  ;;  %vm229_vm5 = vcmp.eq.s32.totalorder %v1489_v14, %v1447_v8  ;;  %vm230_vm6 = vcmp.eq.s32.totalorder %v1492_v15, %v1447_v8  ;;  %vm387_vm7 = vcmp.eq.s32.totalorder %v1430_v2, %v1502_v16 }
  0x26   :  { %vm1506_vm0 = vmpackc.low %vm160_vm13, %vm159_vm12  ;;  %vm388_vm8 = vcmp.eq.s32.totalorder %v1433_v3, %v1502_v16  ;;  %vm156_vm12 = vcmp.eq.s32.totalorder %v1514_v19, %v1444_v7  ;;  %v1542_v21 = vadd.s32 32, %v1427_v1  ;;  %v1545_v22 = vadd.s32 40, %v1427_v1 }
  0x27   :  { %947 = vmatpush.bf16.msk.msra.mxu0 %vm1480_vm10, %v1372_v12  ;;  %v2286_v17 = vsel %vm1506_vm0, 4294967295, %v2285_v17  ;;  %vm972_vm1 = vmpackc.low %vm232_vm15, %vm231_vm14  ;;  %vm227_vm14 = vcmp.eq.s32.totalorder %v1511_v18, %v1447_v8  ;;  %vm228_vm15 = vcmp.eq.s32.totalorder %v1514_v19, %v1447_v8  ;;  %v1576_v25 = vadd.s32 16, %v1427_v1 }
  0x28   :  { %971 = vmatpush.bf16.msk.msra.mxu1 %vm970_vm11, %v1372_v12  ;;  %995 = vmatpush.bf16.msk.msra.mxu2 %vm970_vm11, %v1372_v12  ;;  %vm1533_vm9 = vmpackc.low %vm158_vm3, %vm157_vm2  ;;  %vm155_vm11 = vcmp.eq.s32.totalorder %v1511_v18, %v1444_v7  ;;  %vm385_vm2 = vcmp.eq.s32.totalorder %v1438_v5, %v1502_v16  ;;  %vm386_vm3 = vcmp.eq.s32.totalorder %v1441_v6, %v1502_v16  ;;  %v1579_v26 = vadd.s32 24, %v1427_v1 }
  0x29   :  { %v2288_v20 = vsel %vm1533_vm9, 4294967295, %v2287_v20  ;;  %vm974_vm13 = vmpackc.low %vm230_vm6, %vm229_vm5  ;;  %v1610_v29 = vadd.s32 8, %v1427_v1  ;;  %v2301_v33 = vmov 0  ;;  %v2303_v34 = vmov 0 }
  0x2a   :  { %vm1562_vm5 = vmpackc.low %vm156_vm12, %vm155_vm11  ;;  %vm383_vm12 = vcmp.eq.s32.totalorder %v1450_v9, %v1502_v16  ;;  %vm224_vm10 = vcmp.eq.s32.totalorder %v1579_v26, %v1447_v8  ;;  %v2307_v37 = vmov 0  ;;  %v2311_v41 = vmov 0 }
  0x2b   :  { %949 = vmatpush.bf16.msk.msra.mxu0 %vm1506_vm0, %v1372_v12  ;;  %v2292_v24 = vsel %vm1562_vm5, 4294967295, %v2291_v24  ;;  %vm976_vm6 = vmpackc.low %vm228_vm15, %vm227_vm14  ;;  %vm225_vm14 = vcmp.eq.s32.totalorder %v1542_v21, %v1447_v8  ;;  %vm226_vm15 = vcmp.eq.s32.totalorder %v1545_v22, %v1447_v8  ;;  %vm223_vm0 = vcmp.eq.s32.totalorder %v1576_v25, %v1447_v8 }
  0x2c   :  { %973 = vmatpush.bf16.msk.msra.mxu1 %vm972_vm1, %v1372_v12  ;;  %997 = vmatpush.bf16.msk.msra.mxu2 %vm972_vm1, %v1372_v12  ;;  %vm1551_vm1 = vmpackc.low %vm388_vm8, %vm387_vm7  ;;  %vm153_vm7 = vcmp.eq.s32.totalorder %v1542_v21, %v1444_v7  ;;  %vm154_vm8 = vcmp.eq.s32.totalorder %v1545_v22, %v1444_v7  ;;  %v1733_v42 = vperm.slane %v1435_v4, 2  ;;  %v2316_v44 = vmov 0 }
  0x2d   :  { %1009 = vmatpush.bf16.msk.msra.mxu3 %vm1551_vm1, %v1372_v12  ;;  %vm1581_vm11 = vmpackc.low %vm386_vm3, %vm385_vm2  ;;  %vm151_vm3 = vcmp.eq.s32.totalorder %v1576_v25, %v1444_v7  ;;  %v2322_v46 = vmov 0  ;;  %v2328_v49 = vmov 0  ;;  %v2333_v53 = vmov 0 }
  0x2e   :  { %vm1596_vm2 = vmpackc.low %vm154_vm8, %vm153_vm7  ;;  %v1858_v54 = vperm.slane %v1435_v4, 3  ;;  %v2335_v55 = vmov 0  ;;  %v2338_v56 = vmov 0 }
  0x2f   :  { %951 = vmatpush.bf16.msk.msra.mxu0 %vm1533_vm9, %v1372_v12  ;;  %v2296_v28 = vsel %vm1596_vm2, 4294967295, %v2295_v28  ;;  %vm152_vm9 = vcmp.eq.s32.totalorder %v1579_v26, %v1444_v7  ;;  %vm978_vm8 = vmpackc.low %vm226_vm15, %vm225_vm14 }
  0x30   :  { %975 = vmatpush.bf16.msk.msra.mxu1 %vm974_vm13, %v1372_v12  ;;  %999 = vmatpush.bf16.msk.msra.mxu2 %vm974_vm13, %v1372_v12  ;;  %vm384_vm13 = vcmp.eq.s32.totalorder %v1453_v10, %v1502_v16  ;;  %vm980_vm15 = vmpackc.low %vm224_vm10, %vm223_vm0  ;;  %vm567_vm10 = vcmp.eq.s32.totalorder %v1430_v2, %v1635_v32  ;;  %vm568_vm0 = vcmp.eq.s32.totalorder %v1433_v3, %v1635_v32 }
  0x31   :  { %1011 = vmatpush.bf16.msk.msra.mxu3 %vm1581_vm11, %v1372_v12  ;;  %vm1612_vm7 = vmpackc.low %vm384_vm13, %vm383_vm12  ;;  %vm149_vm13 = vcmp.eq.s32.totalorder %v1427_v1, %v1444_v7 }
  0x32   :  { %v2298_v30 = vsel %vm1612_vm7, 4294967295, %v2297_v30  ;;  %vm1627_vm12 = vmpackc.low %vm152_vm9, %vm151_vm3  ;;  %vm150_vm9 = vcmp.eq.s32.totalorder %v1610_v29, %v1444_v7  ;;  %vm379_vm3 = vcmp.eq.s32.totalorder %v1511_v18, %v1502_v16 }
  0x33   :  { %953 = vmatpush.bf16.msk.msra.mxu0 %vm1562_vm5, %v1372_v12  ;;  %vm381_vm5 = vcmp.eq.s32.totalorder %v1489_v14, %v1502_v16  ;;  %v2300_v31 = vsel %vm1627_vm12, 4294967295, %v2299_v31 }
  0x34   :  { %977 = vmatpush.bf16.msk.msra.mxu1 %vm976_vm6, %v1372_v12  ;;  %1001 = vmatpush.bf16.msk.msra.mxu2 %vm976_vm6, %v1372_v12  ;;  %vm382_vm6 = vcmp.eq.s32.totalorder %v1492_v15, %v1502_v16 }
  0x35   :  { %1013 = vmatpush.bf16.msk.msra.mxu3 %vm1612_vm7, %v1372_v12  ;;  %vm1643_vm14 = vmpackc.low %vm382_vm6, %vm381_vm5  ;;  %vm222_vm7 = vcmp.eq.s32.totalorder %v1610_v29, %v1447_v8 }
  0x36   :  { %v2302_v33 = vsel %vm1643_vm14, 4294967295, %v2301_v33  ;;  %vm1658_vm5 = vmpackc.low %vm150_vm9, %vm149_vm13 }
  0x37   :  { %955 = vmatpush.bf16.msk.msra.mxu0 %vm1596_vm2, %v1372_v12  ;;  %vm380_vm2 = vcmp.eq.s32.totalorder %v1514_v19, %v1502_v16  ;;  %v2304_v34 = vsel %vm1658_vm5, 4294967295, %v2303_v34  ;;  %vm1677_vm9 = vmpackc.low %vm568_vm0, %vm567_vm10  ;;  %vm2315_vm10 = vnez %v2284_v13 }
  0x38   :  { %979 = vmatpush.bf16.msk.msra.mxu1 %vm978_vm8, %v1372_v12  ;;  %1003 = vmatpush.bf16.msk.msra.mxu2 %vm978_vm8, %v1372_v12  ;;  %vm221_vm8 = vcmp.eq.s32.totalorder %v1427_v1, %v1447_v8  ;;  %vm1671_vm6 = vmpackc.low %vm380_vm2, %vm379_vm3  ;;  %v2308_v37 = vsel %vm1677_vm9, 4294967295, %v2307_v37  ;;  %vm565_vm2 = vcmp.eq.s32.totalorder %v1438_v5, %v1635_v32 }
  0x39   :  { %1015 = vmatpush.bf16.msk.msra.mxu3 %vm1643_vm14, %v1372_v12  ;;  %vm982_vm13 = vmpackc.low %vm222_vm7, %vm221_vm8  ;;  %vm378_vm14 = vcmp.eq.s32.totalorder %v1545_v22, %v1502_v16  ;;  %vm566_vm7 = vcmp.eq.s32.totalorder %v1441_v6, %v1635_v32  ;;  %vm375_vm8 = vcmp.eq.s32.totalorder %v1576_v25, %v1502_v16 }
  0x3a   :  { %vm1715_vm3 = vmpackc.low %vm566_vm7, %vm565_vm2  ;;  %vm374_vm2 = vcmp.eq.s32.totalorder %v1610_v29, %v1502_v16  ;;  %vm562_vm7 = vcmp.eq.s32.totalorder %v1492_v15, %v1635_v32 }
  0x3b   :  { %957 = vmatpush.bf16.msk.msra.mxu0 %vm1627_vm12, %v1372_v12  ;;  %vm377_vm12 = vcmp.eq.s32.totalorder %v1542_v21, %v1502_v16  ;;  %v2312_v41 = vsel %vm1715_vm3, 4294967295, %v2311_v41 }
  0x3c   :  { %981 = vmatpush.bf16.msk.msra.mxu1 %vm980_vm15, %v1372_v12  ;;  %1005 = vmatpush.bf16.msk.msra.mxu2 %vm980_vm15, %v1372_v12  ;;  %vm1707_vm15 = vmpackc.low %vm378_vm14, %vm377_vm12  ;;  %vm563_vm12 = vcmp.eq.s32.totalorder %v1450_v9, %v1635_v32 }
  0x3d   :  { %1017 = vmatpush.bf16.msk.msra.mxu3 %vm1671_vm6, %v1372_v12 }
  0x3f   :  { %959 = vmatpush.bf16.msk.msra.mxu0 %vm1658_vm5, %v1372_v12 }
  0x40   :  { %983 = vmatpush.bf16.msk.msra.mxu1 %vm982_vm13, %v1372_v12  ;;  %1007 = vmatpush.bf16.msk.msra.mxu2 %vm982_vm13, %v1372_v12  ;;  %vm373_vm13 = vcmp.eq.s32.totalorder %v1427_v1, %v1502_v16 }
  0x41   :  { %1019 = vmatpush.bf16.msk.msra.mxu3 %vm1707_vm15, %v1372_v12 }
  0x42   :  { %209 = vmatmul.bf16.vlgmr.msra.gmra.mxu0 %v1675_v36 }
  0x43   :  { %1025 = vmatpush.bf16.msk.msrb.mxu0 %vm1551_vm1, %v1372_v12  ;;  %vm376_vm1 = vcmp.eq.s32.totalorder %v1579_v26, %v1502_v16  ;;  %281 = vmatmul.bf16.vlgmr.msra.gmra.mxu1 %v1688_v38 }
  0x44   :  { %1065 = vmatpush.bf16.msk.msrb.mxu2 %vm1677_vm9, %v1372_v12  ;;  %1049 = vmatpush.bf16.msk.msrb.mxu1 %vm1463_vm4, %v1372_v12  ;;  %vm564_vm4 = vcmp.eq.s32.totalorder %v1453_v10, %v1635_v32  ;;  %vm1741_vm14 = vmpackc.low %vm376_vm1, %vm375_vm8  ;;  %vm627_vm8 = vcmp.eq.s32.totalorder %v1430_v2, %v1733_v42  ;;  %vm628_vm1 = vcmp.eq.s32.totalorder %v1433_v3, %v1733_v42 }
  0x45   :  { %312 = vmatmul.bf16.vlgmr.msra.gmra.mxu2 %v1690_v39  ;;  %vm1748_vm0 = vmpackc.low %vm564_vm4, %vm563_vm12  ;;  %1021 = vmatpush.bf16.msk.msra.mxu3 %vm1741_vm14, %v1372_v12  ;;  %vm2318_vm12 = vnez %v2298_v30  ;;  %vm559_vm9 = vcmp.eq.s32.totalorder %v1511_v18, %v1635_v32 }
  0x46   :  { %v2317_v44 = vsel %vm1748_vm0, 4294967295, %v2316_v44  ;;  %vm1773_vm4 = vmpackc.low %vm374_vm2, %vm373_vm13  ;;  %vm2326_vm13 = vnez %v2302_v33  ;;  %vm2327_vm2 = vnez %v2288_v20 }
  0x47   :  { %1027 = vmatpush.bf16.msk.msrb.mxu0 %vm1581_vm11, %v1372_v12  ;;  %vm561_vm11 = vcmp.eq.s32.totalorder %v1489_v14, %v1635_v32  ;;  %vm1788_vm5 = vmpackc.low %vm628_vm1, %vm627_vm8  ;;  %vm626_vm8 = vcmp.eq.s32.totalorder %v1441_v6, %v1733_v42 }
  0x48   :  { %1067 = vmatpush.bf16.msk.msrb.mxu2 %vm1715_vm3, %v1372_v12  ;;  %1051 = vmatpush.bf16.msk.msrb.mxu1 %vm2315_vm10, %v1372_v12  ;;  %vm2321_vm10 = vnez %v2286_v17  ;;  %vm1780_vm3 = vmpackc.low %vm562_vm7, %vm561_vm11  ;;  %vm625_vm7 = vcmp.eq.s32.totalorder %v1438_v5, %v1733_v42 }
  0x49   :  { %v2323_v46 = vsel %vm1780_vm3, 4294967295, %v2322_v46  ;;  %1023 = vmatpush.bf16.msk.msra.mxu3 %vm1773_vm4, %v1372_v12  ;;  %vm1832_vm1 = vmpackc.low %vm626_vm8, %vm625_vm7  ;;  %vm556_vm7 = vcmp.eq.s32.totalorder %v1579_v26, %v1635_v32 }
  0x4b   :  { %1029 = vmatpush.bf16.msk.msrb.mxu0 %vm2318_vm12, %v1372_v12  ;;  %vm2332_vm12 = vnez %v2292_v24 }
  0x4c   :  { %1069 = vmatpush.bf16.msk.msrb.mxu2 %vm1748_vm0, %v1372_v12  ;;  %1053 = vmatpush.bf16.msk.msrb.mxu1 %vm2321_vm10, %v1372_v12  ;;  %vm560_vm0 = vcmp.eq.s32.totalorder %v1514_v19, %v1635_v32 }
  0x4d   :  { %vm1806_vm11 = vmpackc.low %vm560_vm0, %vm559_vm9  ;;  %1081 = vmatpush.bf16.msk.msrb.mxu3 %vm1788_vm5, %v1372_v12  ;;  %vm557_vm9 = vcmp.eq.s32.totalorder %v1542_v21, %v1635_v32  ;;  %vm558_vm0 = vcmp.eq.s32.totalorder %v1545_v22, %v1635_v32 }
  0x4e   :  { %v2329_v49 = vsel %vm1806_vm11, 4294967295, %v2328_v49  ;;  %421 = vmatmul.bf16.vlgmr.msra.gmra.mxu3 %v1688_v38  ;;  %vm1840_vm10 = vmpackc.low %vm558_vm0, %vm557_vm9  ;;  %vm2337_vm9 = vnez %v2296_v28 }
  0x4f   :  { %1031 = vmatpush.bf16.msk.msrb.mxu0 %vm2326_vm13, %v1372_v12  ;;  %v2334_v53 = vsel %vm1840_vm10, 4294967295, %v2333_v53  ;;  %vm623_vm13 = vcmp.eq.s32.totalorder %v1450_v9, %v1733_v42 }
  0x50   :  { %1071 = vmatpush.bf16.msk.msrb.mxu2 %vm1780_vm3, %v1372_v12  ;;  %1055 = vmatpush.bf16.msk.msrb.mxu1 %vm2327_vm2, %v1372_v12  ;;  %vm555_vm2 = vcmp.eq.s32.totalorder %v1576_v25, %v1635_v32 }
  0x51   :  { %1083 = vmatpush.bf16.msk.msrb.mxu3 %vm1832_vm1, %v1372_v12  ;;  %vm1873_vm0 = vmpackc.low %vm556_vm7, %vm555_vm2  ;;  %vm756_vm2 = vcmp.eq.s32.totalorder %v1433_v3, %v1858_v54 }
  0x52   :  { %214 = vmatmul.bf16.gmra.mxu0 %v1804_v48  ;;  %v2339_v56 = vsel %vm1873_vm0, 4294967295, %v2338_v56 }
  0x53   :  { %1033 = vmatpush.bf16.msk.msrb.mxu0 %vm1671_vm6, %v1372_v12  ;;  %vm624_vm6 = vcmp.eq.s32.totalorder %v1453_v10, %v1733_v42  ;;  %286 = vmatmul.bf16.gmra.mxu1 %v1817_v50 }
  0x54   :  { %1073 = vmatpush.bf16.msk.msrb.mxu2 %vm1806_vm11, %v1372_v12  ;;  %1057 = vmatpush.bf16.msk.msrb.mxu1 %vm2332_vm12, %v1372_v12  ;;  %vm1866_vm8 = vmpackc.low %vm624_vm6, %vm623_vm13  ;;  %vm621_vm12 = vcmp.eq.s32.totalorder %v1489_v14, %v1733_v42  ;;  %vm554_vm13 = vcmp.eq.s32.totalorder %v1610_v29, %v1635_v32  ;;  %vm755_vm6 = vcmp.eq.s32.totalorder %v1430_v2, %v1858_v54  ;;  %v1165_v2 = vld [vmem:[#allocation10 + $0x8] sm:$0xff] }
  0x55   :  { %317 = vmatmul.bf16.gmra.mxu2 %v1819_v51  ;;  %v2336_v55 = vsel %vm1866_vm8, 4294967295, %v2335_v55  ;;  %1085 = vmatpush.bf16.msk.msrb.mxu3 %vm1866_vm8, %v1372_v12  ;;  %vm1112_vm3 = vmpackc.low %vm756_vm2, %vm755_vm6  ;;  %vm620_vm8 = vcmp.eq.s32.totalorder %v1514_v19, %v1733_v42  ;;  %vm615_vm2 = vcmp.eq.s32.totalorder %v1576_v25, %v1733_v42 }
  0x57   :  { %1035 = vmatpush.bf16.msk.msrb.mxu0 %vm1707_vm15, %v1372_v12  ;;  %vm553_vm15 = vcmp.eq.s32.totalorder %v1427_v1, %v1635_v32 }
  0x58   :  { %1075 = vmatpush.bf16.msk.msrb.mxu2 %vm1840_vm10, %v1372_v12  ;;  %1059 = vmatpush.bf16.msk.msrb.mxu1 %vm2337_vm9, %v1372_v12  ;;  %vm622_vm10 = vcmp.eq.s32.totalorder %v1492_v15, %v1733_v42  ;;  %vm2342_vm9 = vnez %v2300_v31  ;;  %vm1905_vm11 = vmpackc.low %vm554_vm13, %vm553_vm15 }
  0x59   :  { %vm1898_vm7 = vmpackc.low %vm622_vm10, %vm621_vm12  ;;  %vm754_vm10 = vcmp.eq.s32.totalorder %v1441_v6, %v1858_v54  ;;  %vm2345_vm12 = vnez %v2304_v34 }
  0x5a   :  { %1087 = vmatpush.bf16.msk.msrb.mxu3 %vm1898_vm7, %v1372_v12 }
  0x5b   :  { %1037 = vmatpush.bf16.msk.msrb.mxu0 %vm1741_vm14, %v1372_v12  ;;  %vm753_vm14 = vcmp.eq.s32.totalorder %v1438_v5, %v1858_v54 }
  0x5c   :  { %1077 = vmatpush.bf16.msk.msrb.mxu2 %vm1873_vm0, %v1372_v12  ;;  %1061 = vmatpush.bf16.msk.msrb.mxu1 %vm2342_vm9, %v1372_v12  ;;  %vm619_vm0 = vcmp.eq.s32.totalorder %v1511_v18, %v1733_v42  ;;  %vm1940_vm13 = vmpackc.low %vm754_vm10, %vm753_vm14  ;;  %vm616_vm9 = vcmp.eq.s32.totalorder %v1579_v26, %v1733_v42  ;;  %vm749_vm14 = vcmp.eq.s32.totalorder %v1489_v14, %v1858_v54 }
  0x5d   :  { %vm1930_vm15 = vmpackc.low %vm620_vm8, %vm619_vm0  ;;  %vm618_vm8 = vcmp.eq.s32.totalorder %v1545_v22, %v1733_v42  ;;  %vm751_vm0 = vcmp.eq.s32.totalorder %v1450_v9, %v1858_v54  ;;  %vm750_vm10 = vcmp.eq.s32.totalorder %v1492_v15, %v1858_v54 }
  0x5e   :  { %426 = vmatmul.bf16.gmra.mxu3 %v1817_v50 }
  0x5f   :  { %1039 = vmatpush.bf16.msk.msrb.mxu0 %vm1773_vm4, %v1372_v12  ;;  %vm617_vm4 = vcmp.eq.s32.totalorder %v1542_v21, %v1733_v42  ;;  %1089 = vmatpush.bf16.msk.msrb.mxu3 %vm1930_vm15, %v1372_v12 }
  0x60   :  { %1079 = vmatpush.bf16.msk.msrb.mxu2 %vm1905_vm11, %v1372_v12  ;;  %1063 = vmatpush.bf16.msk.msrb.mxu1 %vm2345_vm12, %v1372_v12  ;;  %vm1984_vm12 = vmpackc.low %vm616_vm9, %vm615_vm2 }
  0x62   :  { %440 = vmatmul.bf16.vlgmr.msrb.gmra.mxu0 %v1690_v39 }
  0x63   :  { %1097 = vmatpush.bf16.msk.msra.mxu0 %vm1788_vm5, %v1372_v12  ;;  %vm752_vm5 = vcmp.eq.s32.totalorder %v1453_v10, %v1858_v54  ;;  %520 = vmatmul.bf16.vlgmr.msrb.gmra.mxu1 %v1934_v60 }
  0x64   :  { %1129 = vmatpush.bf16.msk.msra.mxu2 %vm1112_vm3, %v1372_v12  ;;  %1113 = vmatpush.bf16.msk.msra.mxu1 %vm1112_vm3, %v1372_v12  ;;  %vm1960_vm3 = vmpackc.low %vm618_vm8, %vm617_vm4  ;;  %vm614_vm4 = vcmp.eq.s32.totalorder %v1610_v29, %v1733_v42  ;;  %vm2354_vm8 = vnez %v2336_v55 }
  0x65   :  { %601 = vmatmul.bf16.vlgmr.msrb.gmra.mxu2 %v1675_v36  ;;  %vm1116_vm6 = vmpackc.low %vm752_vm5, %vm751_vm0  ;;  %1091 = vmatpush.bf16.msk.msrb.mxu3 %vm1960_vm3, %v1372_v12  ;;  %vm747_vm0 = vcmp.eq.s32.totalorder %v1511_v18, %v1858_v54  ;;  %vm748_vm5 = vcmp.eq.s32.totalorder %v1514_v19, %v1858_v54 }
  0x66   :  { %vm1120_vm9 = vmpackc.low %vm748_vm5, %vm747_vm0  ;;  %vm2358_vm0 = vnez %v2312_v41 }
  0x67   :  { %1099 = vmatpush.bf16.msk.msra.mxu0 %vm1832_vm1, %v1372_v12  ;;  %vm1118_vm1 = vmpackc.low %vm750_vm10, %vm749_vm14  ;;  %vm746_vm14 = vcmp.eq.s32.totalorder %v1545_v22, %v1858_v54  ;;  %vm2357_vm10 = vnez %v2308_v37 }
  0x68   :  { %1131 = vmatpush.bf16.msk.msra.mxu2 %vm1940_vm13, %v1372_v12  ;;  %1115 = vmatpush.bf16.msk.msra.mxu1 %vm1940_vm13, %v1372_v12  ;;  %vm613_vm13 = vcmp.eq.s32.totalorder %v1427_v1, %v1733_v42 }
  0x69   :  { %1093 = vmatpush.bf16.msk.msrb.mxu3 %vm1984_vm12, %v1372_v12  ;;  %vm2004_vm2 = vmpackc.low %vm614_vm4, %vm613_vm13  ;;  %vm744_vm13 = vcmp.eq.s32.totalorder %v1579_v26, %v1858_v54 }
  0x6b   :  { %1101 = vmatpush.bf16.msk.msra.mxu0 %vm2354_vm8, %v1372_v12  ;;  %vm742_vm8 = vcmp.eq.s32.totalorder %v1610_v29, %v1858_v54 }
  0x6c   :  { %1133 = vmatpush.bf16.msk.msra.mxu2 %vm1116_vm6, %v1372_v12  ;;  %1117 = vmatpush.bf16.msk.msra.mxu1 %vm1116_vm6, %v1372_v12  ;;  %vm745_vm6 = vcmp.eq.s32.totalorder %v1542_v21, %v1858_v54 }
  0x6d   :  { %1095 = vmatpush.bf16.msk.msrb.mxu3 %vm2004_vm2, %v1372_v12 }
  0x6f   :  { %1103 = vmatpush.bf16.msk.msra.mxu0 %vm1898_vm7, %v1372_v12  ;;  %vm1122_vm7 = vmpackc.low %vm746_vm14, %vm745_vm6  ;;  %vm2363_vm6 = vnez %v2339_v56 }
  0x70   :  { %1135 = vmatpush.bf16.msk.msra.mxu2 %vm1118_vm1, %v1372_v12  ;;  %1119 = vmatpush.bf16.msk.msra.mxu1 %vm1118_vm1, %v1372_v12  ;;  %vm743_vm1 = vcmp.eq.s32.totalorder %v1576_v25, %v1858_v54 }
  0x71   :  { %1145 = vmatpush.bf16.msk.msra.mxu3 %vm2357_vm10, %v1372_v12  ;;  %vm1124_vm4 = vmpackc.low %vm744_vm13, %vm743_vm1 }
  0x72   :  { %661 = vmatmul.bf16.vlgmr.msrb.gmra.mxu3 %v1688_v38  ;;  %445 = vmatmul.bf16.gmra.mxu0 %v1819_v51 }
  0x73   :  { %1105 = vmatpush.bf16.msk.msra.mxu0 %vm1930_vm15, %v1372_v12  ;;  %525 = vmatmul.bf16.gmra.mxu1 %v1165_v2  ;;  %vm741_vm15 = vcmp.eq.s32.totalorder %v1427_v1, %v1858_v54 }
  0x74   :  { %1137 = vmatpush.bf16.msk.msra.mxu2 %vm1120_vm9, %v1372_v12  ;;  %1121 = vmatpush.bf16.msk.msra.mxu1 %vm1120_vm9, %v1372_v12  ;;  %vm1126_vm5 = vmpackc.low %vm742_vm8, %vm741_vm15  ;;  %vm2360_vm9 = vnez %v2323_v46 }
  0x75   :  { %606 = vmatmul.bf16.gmra.mxu2 %v1804_v48  ;;  %1147 = vmatpush.bf16.msk.msra.mxu3 %vm2358_vm0, %v1372_v12 }
  0x77   :  { %1107 = vmatpush.bf16.msk.msra.mxu0 %vm1960_vm3, %v1372_v12  ;;  %vm2359_vm3 = vnez %v2317_v44 }
  0x78   :  { %1139 = vmatpush.bf16.msk.msra.mxu2 %vm1122_vm7, %v1372_v12  ;;  %1123 = vmatpush.bf16.msk.msra.mxu1 %vm1122_vm7, %v1372_v12 }
  0x79   :  { %1149 = vmatpush.bf16.msk.msra.mxu3 %vm2359_vm3, %v1372_v12 }
  0x7b   :  { %1109 = vmatpush.bf16.msk.msra.mxu0 %vm1984_vm12, %v1372_v12  ;;  %vm2361_vm12 = vnez %v2329_v49 }
  0x7c   :  { %1141 = vmatpush.bf16.msk.msra.mxu2 %vm1124_vm4, %v1372_v12  ;;  %1125 = vmatpush.bf16.msk.msra.mxu1 %vm1124_vm4, %v1372_v12 }
  0x7d   :  { %1151 = vmatpush.bf16.msk.msra.mxu3 %vm2360_vm9, %v1372_v12 }
  0x7f   :  { %1111 = vmatpush.bf16.msk.msra.mxu0 %vm2004_vm2, %v1372_v12  ;;  %vm2362_vm2 = vnez %v2334_v53 }
  0x80   :  { %1143 = vmatpush.bf16.msk.msra.mxu2 %vm1126_vm5, %v1372_v12  ;;  %1127 = vmatpush.bf16.msk.msra.mxu1 %vm1126_vm5, %v1372_v12 }
  0x81   :  { %1153 = vmatpush.bf16.msk.msra.mxu3 %vm2361_vm12, %v1372_v12 }
  0x82   :  { %666 = vmatmul.bf16.gmra.mxu3 %v1817_v50  ;;  %680 = vmatmul.bf16.vlgmr.msra.gmra.mxu0 %v1690_v39 }
  0x83   :  { %789 = vmatmul.bf16.vlgmr.msra.gmra.mxu1 %v1688_v38 }
  0x85   :  { %808 = vmatmul.bf16.vlgmr.msra.gmra.mxu2 %v1690_v39  ;;  %1155 = vmatpush.bf16.msk.msra.mxu3 %vm2362_vm2, %v1372_v12 }
  0x89   :  { %1157 = vmatpush.bf16.msk.msra.mxu3 %vm2363_vm6, %v1372_v12 }
  0x8d   :  { %1159 = vmatpush.bf16.msk.msra.mxu3 %vm1905_vm11, %v1372_v12 }
  0x92   :  { %876 = vmatmul.bf16.vlgmr.msra.gmra.mxu3 %v1934_v60  ;;  %685 = vmatmul.bf16.gmra.mxu0 %v1819_v51 }
  0x93   :  { %794 = vmatmul.bf16.gmra.mxu1 %v1817_v50 }
  0x95   :  { %813 = vmatmul.bf16.gmra.mxu2 %v1819_v51 }
  0xa2   :  { %881 = vmatmul.bf16.gmra.mxu3 %v1165_v2 }
  0xbf   :  { %v2082_v1 = vpop.f32.mrf.mxu0 }
  0xc0   :  { %v282_v3 = vpop.f32.mrf.mxu1 }
  0xc7   :  { %v2084_v6 = vpop.f32.mrf.mxu0 }
  0xc8   :  { %v313_v4 = vpop.f32.mrf.mxu2  ;;  %v284_v7 = vpop.f32.mrf.mxu1 }
  0xc9   :  { %v323_v5 = vmul.f32 %v313_v4, %v282_v3 }
  0xcf   :  { %v2086_v10 = vpop.f32.mrf.mxu0 }
  0xd0   :  { %v315_v8 = vpop.f32.mrf.mxu2  ;;  %v287_v11 = vpop.f32.mrf.mxu1 }
  0xd1   :  { %v324_v9 = vmul.f32 %v315_v8, %v284_v7  ;;  %v2088_v13 = vpop.f32.mrf.mxu3 }
  0xd3   :  { %v327_v12 = vadd.f32 %v324_v9, %v323_v5 }
  0xd7   :  { %v2090_v16 = vpop.f32.mrf.mxu0 }
  0xd8   :  { %v318_v14 = vpop.f32.mrf.mxu2  ;;  %v289_v17 = vpop.f32.mrf.mxu1 }
  0xd9   :  { %v325_v15 = vmul.f32 %v318_v14, %v287_v11  ;;  %v2092_v19 = vpop.f32.mrf.mxu3 }
  0xdb   :  { %v328_v18 = vadd.f32 %v327_v12, %v325_v15 }
  0xdf   :  { %v441_v22 = vpop.f32.mrf.mxu0 }
  0xe0   :  { %v320_v20 = vpop.f32.mrf.mxu2  ;;  %v2094_v23 = vpop.f32.mrf.mxu1  ;;  %v451_v50 = vmul.f32 %v441_v22, %v2088_v13 }
  0xe1   :  { %v326_v21 = vmul.f32 %v320_v20, %v289_v17  ;;  %v2096_v27 = vpop.f32.mrf.mxu3 }
  0xe3   :  { %v329_v24 = vadd.f32 %v328_v18, %v326_v21 }
  0xe5   :  { %v330_v25 = vrot.slane %v329_v24, 4 }
  0xe7   :  { %v331_v26 = vadd.f32 %v330_v25, %v329_v24  ;;  %v443_v30 = vpop.f32.mrf.mxu0 }
  0xe8   :  { %v2098_v28 = vpop.f32.mrf.mxu2  ;;  %v2100_v31 = vpop.f32.mrf.mxu1  ;;  %v452_v47 = vmul.f32 %v443_v30, %v2092_v19 }
  0xe9   :  { %v332_v29 = vrot.slane %v331_v26, 2  ;;  %v429_v41 = vpop.f32.mrf.mxu3 }
  0xea   :  { %v455_v54 = vadd.f32 %v452_v47, %v451_v50 }
  0xeb   :  { %v333_v32 = vadd.f32 %v332_v29, %v331_v26 }
  0xed   :  { %v334_v33 = vrot.slane %v333_v32, 1 }
  0xef   :  { %v335_v34 = vadd.f32 %v334_v33, %v333_v32  ;;  %v446_v40 = vpop.f32.mrf.mxu0 }
  0xf0   :  { %v2102_v35 = vpop.f32.mrf.mxu2  ;;  %v2108_v42 = vpop.f32.mrf.mxu1  ;;  %v453_v51 = vmul.f32 %v446_v40, %v2096_v27 }
  0xf1   :  { %v337_v36 = vmul.f32 %v335_v34, %v2084_v6  ;;  %v338_v37 = vmul.f32 %v335_v34, %v2086_v10  ;;  %v339_v38 = vmul.f32 %v335_v34, %v2090_v16  ;;  %v336_v39 = vmul.f32 %v335_v34, %v2082_v1 }
  0xf2   :  { %v456_v59 = vadd.f32 %v455_v54, %v453_v51 }
  0xf3   :  { %v2110_v43 = vadd.f32 %v337_v36, %v284_v7  ;;  %v2112_v44 = vadd.f32 %v338_v37, %v287_v11  ;;  %v2114_v45 = vadd.f32 %v339_v38, %v289_v17  ;;  %v2116_v46 = vadd.f32 %v336_v39, %v282_v3 }
  0xf5   :  { %v344_v48 = vmul.f32 %v2116_v46, %v2116_v46  ;;  %v345_v49 = vmul.f32 %v2110_v43, %v2110_v43  ;;  %v346_v52 = vmul.f32 %v2112_v44, %v2112_v44  ;;  %v347_v56 = vmul.f32 %v2114_v45, %v2114_v45  ;;  %v2133_v63 = vpop.f32.mrf.mxu3 }
  0xf7   :  { %v348_v53 = vadd.f32 %v345_v49, %v344_v48  ;;  %v448_v58 = vpop.f32.mrf.mxu0 }
  0xf8   :  { %v2127_v55 = vpop.f32.mrf.mxu2  ;;  %v454_v60 = vmul.f32 %v448_v58, %v429_v41  ;;  %v2131_v61 = vpop.f32.mrf.mxu1 }
  0xf9   :  { %v349_v57 = vadd.f32 %v348_v53, %v346_v52 }
  0xfa   :  { %v457_v0 = vadd.f32 %v456_v59, %v454_v60 }
  0xfb   :  { %v350_v62 = vadd.f32 %v349_v57, %v347_v56 }
  0xfc   :  { %v458_v3 = vrot.slane %v457_v0, 4 }
  0xfd   :  { %v351_v2 = vrot.slane %v350_v62, 4  ;;  %v2139_v18 = vpop.f32.mrf.mxu3 }
  0xfe   :  { %v459_v5 = vadd.f32 %v458_v3, %v457_v0 }
  0xff   :  { %v352_v4 = vadd.f32 %v351_v2, %v350_v62  ;;  %v681_v9 = vpop.f32.mrf.mxu0 }
 0x100   :  { %v2135_v7 = vpop.f32.mrf.mxu2  ;;  %v460_v11 = vrot.slane %v459_v5, 2  ;;  %v2137_v12 = vpop.f32.mrf.mxu1  ;;  %v691_v54 = vmul.f32 %v681_v9, %v2133_v63 }
 0x101   :  { %v353_v8 = vrot.slane %v352_v4, 2 }
 0x102   :  { %v461_v15 = vadd.f32 %v460_v11, %v459_v5 }
 0x103   :  { %v354_v14 = vadd.f32 %v353_v8, %v352_v4 }
 0x104   :  { %v462_v20 = vrot.slane %v461_v15, 1 }
 0x105   :  { %v355_v17 = vrot.slane %v354_v14, 1 }
 0x106   :  { %v463_v22 = vadd.f32 %v462_v20, %v461_v15 }
 0x107   :  { %v356_v21 = vadd.f32 %v355_v17, %v354_v14  ;;  %v683_v26 = vpop.f32.mrf.mxu0 }
 0x108   :  { %v809_v24 = vpop.f32.mrf.mxu2  ;;  %v464_v29 = vmul.f32 %v463_v22, %v2082_v1  ;;  %v465_v30 = vmul.f32 %v463_v22, %v2084_v6  ;;  %v466_v32 = vmul.f32 %v463_v22, %v2086_v10  ;;  %v467_v33 = vmul.f32 %v463_v22, %v2090_v16  ;;  %v2154_v38 = vpop.f32.mrf.mxu1 }
 0x109   :  { %v357_v25 = vmax.f32 %v356_v21, 1e-24  ;;  %v2162_v10 = vpop.f32.mrf.mxu3  ;;  %v692_v51 = vmul.f32 %v683_v26, %v2139_v18  ;;  %v819_v9 = vmul.f32 %v809_v24, %v2137_v12 }
 0x10a   :  { %v2146_v34 = vadd.f32 %v464_v29, %v2088_v13  ;;  %v2149_v36 = vadd.f32 %v465_v30, %v2092_v19  ;;  %v2152_v37 = vadd.f32 %v466_v32, %v2096_v27  ;;  %v2156_v39 = vadd.f32 %v467_v33, %v429_v41 }
 0x10b   :  { %1178 = vrsqrt.f32 %v357_v25  ;;  %v695_v60 = vadd.f32 %v692_v51, %v691_v54  ;;  %vm364_vm14 = vweird.f32 %v357_v25 }
 0x10c   :  { %v472_v1 = vmul.f32 %v2146_v34, %v2146_v34  ;;  %v473_v6 = vmul.f32 %v2149_v36, %v2149_v36  ;;  %v474_v13 = vmul.f32 %v2152_v37, %v2152_v37  ;;  %v475_v41 = vmul.f32 %v2156_v39, %v2156_v39 }
 0x10e   :  { %v476_v16 = vadd.f32 %v473_v6, %v472_v1 }
 0x10f   :  { %v686_v27 = vpop.f32.mrf.mxu0 }
 0x110   :  { %v811_v19 = vpop.f32.mrf.mxu2  ;;  %v477_v48 = vadd.f32 %v476_v16, %v474_v13  ;;  %v693_v56 = vmul.f32 %v686_v27, %v2162_v10  ;;  %v2171_v57 = vpop.f32.mrf.mxu1 }
 0x111   :  { %v1179_v40 = vpop.eup %1178  ;;  %v820_v0 = vmul.f32 %v811_v19, %v2154_v38  ;;  %v669_v2 = vpop.f32.mrf.mxu3 }
 0x112   :  { %v359_v47 = vmul.f32 %v1179_v40, %v357_v25  ;;  %v478_v50 = vadd.f32 %v477_v48, %v475_v41  ;;  %vm365_vm11 = vweird.f32 %v1179_v40  ;;  %v696_v8 = vadd.f32 %v695_v60, %v693_v56 }
 0x113   :  { %vm366_vm10 = vmor %vm364_vm14, %vm365_vm11  ;;  %v823_v30 = vadd.f32 %v820_v0, %v819_v9 }
 0x114   :  { %v360_v49 = vmul.f32 %v1179_v40, %v359_v47  ;;  %v479_v53 = vrot.slane %v478_v50, 4 }
 0x116   :  { %v361_v52 = vmul.f32 0.5, %v360_v49  ;;  %v480_v59 = vadd.f32 %v479_v53, %v478_v50 }
 0x117   :  { %v688_v3 = vpop.f32.mrf.mxu0 }
 0x118   :  { %v362_v58 = vsub.f32 1.5, %v361_v52  ;;  %v814_v62 = vpop.f32.mrf.mxu2  ;;  %v481_v5 = vrot.slane %v480_v59, 2  ;;  %v694_v11 = vmul.f32 %v688_v3, %v669_v2 }
 0x119   :  { %v821_v17 = vmul.f32 %v814_v62, %v2171_v57 }
 0x11a   :  { %v363_v4 = vmul.f32 %v1179_v40, %v362_v58  ;;  %v482_v15 = vadd.f32 %v481_v5, %v480_v59  ;;  %v697_v20 = vadd.f32 %v696_v8, %v694_v11 }
 0x11c   :  { %v367_v14 = vsel %vm366_vm10, %v1179_v40, %v363_v4  ;;  %v483_v29 = vrot.slane %v482_v15, 1  ;;  %v698_v32 = vrot.slane %v697_v20, 4 }
 0x11d   :  { %v368_v21 = vmul.f32 %v367_v14, %v2116_v46  ;;  %v369_v22 = vmul.f32 %v367_v14, %v2110_v43  ;;  %v370_v25 = vmul.f32 %v367_v14, %v2112_v44  ;;  %v371_v26 = vmul.f32 %v367_v14, %v2114_v45  ;;  %v797_v44 = vpop.f32.mrf.mxu1 }
 0x11e   :  { %v484_v43 = vadd.f32 %v483_v29, %v482_v15  ;;  %v699_v6 = vadd.f32 %v698_v32, %v697_v20  ;;  %v824_v45 = vadd.f32 %v823_v30, %v821_v17 }
 0x11f   :  { %v2181_v33 = vadd.f32 %v2094_v23, %v368_v21  ;;  %v2184_v24 = vadd.f32 %v2100_v31, %v369_v22  ;;  %v2187_v1 = vadd.f32 %v2108_v42, %v370_v25  ;;  %v2190_v46 = vadd.f32 %v2131_v61, %v371_v26 }
 0x120   :  { %v816_v13 = vpop.f32.mrf.mxu2  ;;  %v485_v19 = vmax.f32 %v484_v43, 1e-24  ;;  %v700_v40 = vrot.slane %v699_v6, 2 }
 0x121   :  { %v822_v16 = vmul.f32 %v816_v13, %v797_v44 }
 0x122   :  { %1180 = vrsqrt.f32 %v485_v19  ;;  %v701_v23 = vadd.f32 %v700_v40, %v699_v6  ;;  %vm492_vm1 = vweird.f32 %v485_v19 }
 0x123   :  { %v825_v27 = vadd.f32 %v824_v45, %v822_v16 }
 0x124   :  { %v702_v31 = vrot.slane %v701_v23, 1 }
 0x125   :  { %v826_v47 = vrot.slane %v825_v27, 4 }
 0x126   :  { %v703_v48 = vadd.f32 %v702_v31, %v701_v23 }
 0x127   :  { %v827_v41 = vadd.f32 %v826_v47, %v825_v27 }
 0x128   :  { %v1181_v49 = vpop.eup %1180  ;;  %v705_v61 = vmul.f32 %v703_v48, %v2102_v35  ;;  %v706_v50 = vmul.f32 %v703_v48, %v2127_v55  ;;  %v707_v51 = vmul.f32 %v703_v48, %v2135_v7  ;;  %v704_v52 = vmul.f32 %v703_v48, %v2098_v28 }
 0x129   :  { %v828_v42 = vrot.slane %v827_v41, 2  ;;  %v487_v53 = vmul.f32 %v1181_v49, %v485_v19  ;;  %vm493_vm7 = vweird.f32 %v1181_v49 }
 0x12a   :  { %v2197_v56 = vadd.f32 %v705_v61, %v2139_v18  ;;  %v2200_v58 = vadd.f32 %v706_v50, %v2162_v10  ;;  %v2203_v59 = vadd.f32 %v704_v52, %v2133_v63  ;;  %v2205_v0 = vadd.f32 %v707_v51, %v669_v2  ;;  %vm494_vm13 = vmor %vm492_vm1, %vm493_vm7 }
 0x12b   :  { %v829_v54 = vadd.f32 %v828_v42, %v827_v41  ;;  %v488_v60 = vmul.f32 %v1181_v49, %v487_v53  ;;  %v877_v41 = vpop.f32.mrf.mxu3 }
 0x12c   :  { %v712_v3 = vmul.f32 %v2203_v59, %v2203_v59  ;;  %v713_v4 = vmul.f32 %v2197_v56, %v2197_v56  ;;  %v714_v18 = vmul.f32 %v2200_v58, %v2200_v58  ;;  %v715_v2 = vmul.f32 %v2205_v0, %v2205_v0 }
 0x12d   :  { %v830_v62 = vrot.slane %v829_v54, 1  ;;  %v489_v5 = vmul.f32 0.5, %v488_v60 }
 0x12e   :  { %v716_v10 = vadd.f32 %v713_v4, %v712_v3 }
 0x12f   :  { %v831_v8 = vadd.f32 %v830_v62, %v829_v54  ;;  %v490_v11 = vsub.f32 1.5, %v489_v5 }
 0x130   :  { %v717_v14 = vadd.f32 %v716_v10, %v714_v18 }
 0x131   :  { %v833_v63 = vmul.f32 %v831_v8, %v2102_v35  ;;  %v834_v9 = vmul.f32 %v831_v8, %v2127_v55  ;;  %v832_v15 = vmul.f32 %v831_v8, %v2098_v28  ;;  %v491_v17 = vmul.f32 %v1181_v49, %v490_v11 }
 0x132   :  { %v835_v20 = vmul.f32 %v831_v8, %v2135_v7  ;;  %v718_v22 = vadd.f32 %v717_v14, %v715_v2 }
 0x133   :  { %v2220_v21 = vadd.f32 %v833_v63, %v2154_v38  ;;  %v2223_v25 = vadd.f32 %v832_v15, %v2137_v12  ;;  %v495_v35 = vsel %vm494_vm13, %v1181_v49, %v491_v17  ;;  %v2226_v55 = vadd.f32 %v834_v9, %v2171_v57  ;;  %v879_v53 = vpop.f32.mrf.mxu3 }
 0x134   :  { %v496_v28 = vmul.f32 %v495_v35, %v2146_v34  ;;  %v497_v29 = vmul.f32 %v495_v35, %v2149_v36  ;;  %v498_v7 = vmul.f32 %v495_v35, %v2152_v37  ;;  %v499_v38 = vmul.f32 %v495_v35, %v2156_v39 }
 0x135   :  { %v841_v26 = vmul.f32 %v2220_v21, %v2220_v21  ;;  %v2234_v30 = vadd.f32 %v835_v20, %v797_v44  ;;  %v719_v32 = vrot.slane %v718_v22, 4  ;;  %v840_v12 = vmul.f32 %v2223_v25, %v2223_v25 }
 0x136   :  { %v535_v57 = vsub.f32 %v2181_v33, %v496_v28  ;;  %v536_v43 = vsub.f32 %v2184_v24, %v497_v29  ;;  %v537_v6 = vsub.f32 %v2187_v1, %v498_v7  ;;  %v538_v34 = vsub.f32 %v2190_v46, %v499_v38 }
 0x137   :  { %v720_v13 = vadd.f32 %v719_v32, %v718_v22  ;;  %v842_v36 = vmul.f32 %v2226_v55, %v2226_v55  ;;  %v844_v37 = vadd.f32 %v841_v26, %v840_v12  ;;  %v843_v16 = vmul.f32 %v2234_v30, %v2234_v30 }
 0x138   :  { %v539_v39 = vand.u32 2147483647, %v535_v57  ;;  %v540_v44 = vand.u32 2147483647, %v536_v43  ;;  %v541_v40 = vand.u32 2147483647, %v537_v6 }
 0x139   :  { %v721_v45 = vrot.slane %v720_v13, 2  ;;  %v845_v19 = vadd.f32 %v844_v37, %v842_v36  ;;  %v542_v23 = vand.u32 2147483647, %v538_v34 }
 0x13a   :  { %v543_v33 = vadd.f32 %v540_v44, %v539_v39 }
 0x13b   :  { %v722_v27 = vadd.f32 %v721_v45, %v720_v13  ;;  %v846_v24 = vadd.f32 %v845_v19, %v843_v16  ;;  %v882_v11 = vpop.f32.mrf.mxu3 }
 0x13c   :  { %v544_v1 = vadd.f32 %v543_v33, %v541_v40 }
 0x13d   :  { %v723_v47 = vrot.slane %v722_v27, 1  ;;  %v847_v46 = vrot.slane %v846_v24, 4 }
 0x13e   :  { %v545_v31 = vadd.f32 %v544_v1, %v542_v23 }
 0x13f   :  { %v724_v48 = vadd.f32 %v723_v47, %v722_v27  ;;  %v848_v42 = vadd.f32 %v847_v46, %v846_v24 }
 0x140   :  { %v546_v57 = vrot.slane %v545_v31, 4 }
 0x141   :  { %v725_v49 = vmax.f32 %v724_v48, 1e-24  ;;  %v849_v61 = vrot.slane %v848_v42, 2 }
 0x142   :  { %v547_v37 = vadd.f32 %v546_v57, %v545_v31  ;;  %v908_v31 = vld [vmem:[#allocation5] sm:$0x1] }
 0x143   :  { %1182 = vrsqrt.f32 %v725_v49  ;;  %v850_v50 = vadd.f32 %v849_v61, %v848_v42  ;;  %vm732_vm15 = vweird.f32 %v725_v49  ;;  %v884_v38 = vpop.f32.mrf.mxu3 }
 0x145   :  { %v851_v51 = vrot.slane %v850_v50, 1 }
 0x147   :  { %v852_v52 = vadd.f32 %v851_v51, %v850_v50 }
 0x149   :  { %v1183_v54 = vpop.eup %1182  ;;  %v853_v60 = vmax.f32 %v852_v52, 1e-24 }
 0x14a   :  { %v727_v62 = vmul.f32 %v1183_v54, %v725_v49  ;;  %vm733_vm4 = vweird.f32 %v1183_v54 }
 0x14b   :  { %1184 = vrsqrt.f32 %v853_v60  ;;  %vm734_vm8 = vmor %vm732_vm15, %vm733_vm4  ;;  %vm860_vm5 = vweird.f32 %v853_v60 }
 0x14c   :  { %v728_v3 = vmul.f32 %v1183_v54, %v727_v62 }
 0x14e   :  { %v729_v4 = vmul.f32 0.5, %v728_v3 }
 0x150   :  { %v730_v5 = vsub.f32 1.5, %v729_v4 }
 0x151   :  { %v1185_v8 = vpop.eup %1184 }
 0x152   :  { %v731_v18 = vmul.f32 %v1183_v54, %v730_v5  ;;  %v855_v10 = vmul.f32 %v1185_v8, %v853_v60  ;;  %vm861_vm0 = vweird.f32 %v1185_v8 }
 0x153   :  { %vm862_vm3 = vmor %vm860_vm5, %vm861_vm0 }
 0x154   :  { %v856_v63 = vmul.f32 %v1185_v8, %v855_v10  ;;  %v735_v9 = vsel %vm734_vm8, %v1183_v54, %v731_v18 }
 0x155   :  { %v736_v14 = vmul.f32 %v735_v9, %v2203_v59  ;;  %v737_v17 = vmul.f32 %v735_v9, %v2197_v56  ;;  %v738_v20 = vmul.f32 %v735_v9, %v2200_v58  ;;  %v739_v35 = vmul.f32 %v735_v9, %v2205_v0 }
 0x156   :  { %v857_v2 = vmul.f32 0.5, %v856_v63 }
 0x157   :  { %v887_v28 = vadd.f32 %v877_v41, %v736_v14  ;;  %v888_v29 = vadd.f32 %v879_v53, %v737_v17  ;;  %v889_v7 = vadd.f32 %v882_v11, %v738_v20  ;;  %v890_v34 = vadd.f32 %v884_v38, %v739_v35 }
 0x158   :  { %v858_v15 = vsub.f32 1.5, %v857_v2 }
 0x15a   :  { %v859_v22 = vmul.f32 %v1185_v8, %v858_v15 }
 0x15c   :  { %v863_v26 = vsel %vm862_vm3, %v1185_v8, %v859_v22 }
 0x15d   :  { %v864_v32 = vmul.f32 %v863_v26, %v2223_v25  ;;  %v865_v12 = vmul.f32 %v863_v26, %v2220_v21  ;;  %v866_v59 = vmul.f32 %v863_v26, %v2226_v55  ;;  %v867_v56 = vmul.f32 %v863_v26, %v2234_v30 }
 0x15e   :  { %v548_v25 = vrot.slane %v547_v37, 2 }
 0x15f   :  { %v891_v58 = vsub.f32 %v887_v28, %v864_v32  ;;  %v892_v43 = vsub.f32 %v888_v29, %v865_v12  ;;  %v893_v6 = vsub.f32 %v889_v7, %v866_v59  ;;  %v894_v36 = vsub.f32 %v890_v34, %v867_v56 }
 0x160   :  { %v549_v40 = vadd.f32 %v548_v25, %v547_v37 }
 0x161   :  { %v895_v13 = vand.u32 2147483647, %v891_v58  ;;  %v896_v0 = vand.u32 2147483647, %v892_v43  ;;  %v897_v44 = vand.u32 2147483647, %v893_v6 }
 0x162   :  { %v898_v16 = vand.u32 2147483647, %v894_v36  ;;  %v550_v30 = vrot.slane %v549_v40, 1 }
 0x163   :  { %v899_v39 = vadd.f32 %v896_v0, %v895_v13 }
 0x164   :  { %v551_v23 = vadd.f32 %v550_v30, %v549_v40 }
 0x165   :  { %v900_v45 = vadd.f32 %v899_v39, %v897_v44 }
 0x167   :  { %v901_v19 = vadd.f32 %v900_v45, %v898_v16 }
 0x169   :  { %v902_v21 = vrot.slane %v901_v19, 4 }
 0x16b   :  { %v903_v55 = vadd.f32 %v902_v21, %v901_v19 }
 0x16d   :  { %v904_v33 = vrot.slane %v903_v55, 2 }
 0x16f   :  { %v905_v27 = vadd.f32 %v904_v33, %v903_v55 }
 0x171   :  { %v906_v24 = vrot.slane %v905_v27, 1 }
 0x173   :  { %v907_v1 = vadd.f32 %v906_v24, %v905_v27 }
 0x175   :  { %v909_v47 = vsub.f32 0.0, %v907_v1  ;;  %v911_v46 = vsub.f32 %v551_v23, %v907_v1 }
 0x177   :  { %910 = vst [vmem:[#allocation13] sm:$0x1] %v909_v47  ;;  %v912_v41 = vadd.f32 1.0, %v911_v46 }
 0x179   :  { %v913_v48 = vmax.f32 %v912_v41, 0.0 }
 0x17b   :  { %v914_v42 = vmul.f32 %v913_v48, %v908_v31 }
 0x17d   :  { %915 = vst [vmem:[#allocation13 + $0x1] sm:$0x1] %v914_v42 }
 0x17e   :  { %926 = dma.vmem_to_hbm [thread:$0]  %s922_s5, 32, %s924_s27, [#allocation4]  }
 0x17f   :  { %1362 = dma.done.wait [#allocation4], 32  }
 0x180   :  { %1363 = vsyncadd [#allocation4], 4294967264 }
 0x181   :  { %931 = vsyncpa [#allocation3], 1 }
 0x182   :  { %932 = vsyncpa [#allocation6], 1 }
 0x183   :  { %933 = vsyncpa [#allocation9], 1 }
 0x184   :  { %934 = vsyncpa [#allocation12], 1 }
 0x185   :  { %935 = vsyncpa [#allocation4], 1 }

</bundles_post_ra>
